<compile_context>
chip_gen: v5e
topology: v5e:2x2
jax: 0.10.0
libtpu: 0.0.40
codegen_flags: <defaults>
</compile_context>

<pallas_src>
import functools
import math

import jax
import jax.numpy as jnp
from jax.experimental import pallas as pl
from jax.experimental.pallas import tpu as pltpu


# ---------------------------------------------------------------------------
# Fused bidirectional-LSTM + Dense kernel (single grid step, loop inside).
# ---------------------------------------------------------------------------
def _bilstm_dense_kernel(gx_ref, w_rec_ref, wdf_ref, wdb_ref, bd_ref,
                         out_ref, h_out_ref, c_out_ref,
                         yf_s, yb_s, *, T, B, H):
    """Refs:
      gx_ref    : (T, B, 8H)  precomputed x-projection (+bias) for both directions,
                  natural time order, gate-interleaved columns
                  [i_f i_b | f_f f_b | g_f g_b | o_f o_b].
      w_rec_ref : (2H, 8H)    block-diagonal (per gate) recurrent weights.
      wdf_ref   : (H, NT)     Dense weights acting on the forward half.
      wdb_ref   : (H, NT)     Dense weights acting on the backward half.
      bd_ref    : (1, NT)     Dense bias.
      out_ref   : (T, B, NT)  Dense output.
      h_out_ref : (B, 2H)     final hidden state [h_fwd | h_bwd].
      c_out_ref : (B, 2H)     final cell state   [c_fwd | c_bwd].
      yf_s/yb_s : (T, B, H)   VMEM scratch for per-time forward / backward outputs.
    """
    f32 = jnp.float32
    H2 = 2 * H

    w_rec = w_rec_ref[...]                               # hoisted, loop-invariant

    # Lane mask: within each 2H gate block, the first H lanes belong to the forward
    # direction (reads time s), the next H lanes to the backward direction (reads
    # time T-1-s).  Computed once, reused every step.
    lane = jax.lax.broadcasted_iota(jnp.int32, (B, 8 * H), 1)
    fwd_lane = (lane % H2) < H

    def step(s, carry):
        h, c = carry                                     # (B, 2H) each
        # Input-gate preactivations for this step: forward half from time s,
        # backward half from time T-1-s (reverse indexing, no flips).
        gx = jnp.where(fwd_lane, gx_ref[s], gx_ref[T - 1 - s])          # (B, 8H)
        # Single fused recurrent matmul for both directions.
        gates = gx + jnp.dot(h, w_rec, preferred_element_type=f32)      # (B, 8H)

        i_g = jax.nn.sigmoid(gates[:, 0 * H2:1 * H2])    # (B, 2H)
        f_g = jax.nn.sigmoid(gates[:, 1 * H2:2 * H2])
        g_g = jnp.tanh(gates[:, 2 * H2:3 * H2])
        o_g = jax.nn.sigmoid(gates[:, 3 * H2:4 * H2])

        c_new = f_g * c + i_g * g_g                      # (B, 2H)
        h_new = o_g * jnp.tanh(c_new)                    # (B, 2H)

        yf_s[s] = h_new[:, :H]                           # forward output at time s
        yb_s[T - 1 - s] = h_new[:, H:]                   # backward output at time T-1-s
        return h_new, c_new

    zeros = jnp.zeros((B, H2), f32)
    h_fin, c_fin = jax.lax.fori_loop(0, T, step, (zeros, zeros), unroll=True)

    # Final states: single stores at the end (no per-step writeback).
    h_out_ref[...] = h_fin
    c_out_ref[...] = c_fin

    # Fused Dense epilogue: out[t] = yf[t] @ Wd_f + yb[t] @ Wd_b + b.
    wdf = wdf_ref[...]
    wdb = wdb_ref[...]
    bd = bd_ref[...]

    def dense_step(t, carry):
        out_ref[t] = (jnp.dot(yf_s[t], wdf, preferred_element_type=f32)
                      + jnp.dot(yb_s[t], wdb, preferred_element_type=f32)
                      + bd)
        return carry

    jax.lax.fori_loop(0, T, dense_step, 0, unroll=True)


# ---------------------------------------------------------------------------
# Weight repacking (PyTorch layout -> fused kernel layout).
# ---------------------------------------------------------------------------
def _gate_blocks(w, H):
    """w: (4H, H) PyTorch weight, gate rows [i, f, g, o] -> list of 4 (H, H) = W_gate^T."""
    return [w[g * H:(g + 1) * H, :].T for g in range(4)]


def _build_combined_weights(params, H):
    NT = params["w_dense"].shape[0]
    wih_f = _gate_blocks(params["w_ih_f"], H)
    wih_b = _gate_blocks(params["w_ih_b"], H)
    whh_f = _gate_blocks(params["w_hh_f"], H)
    whh_b = _gate_blocks(params["w_hh_b"], H)
    bf = params["b_ih_f"] + params["b_hh_f"]                         # (4H,)
    bb = params["b_ih_b"] + params["b_hh_b"]                         # (4H,)

    # Input projection (H, 8H): per gate g, columns = [forward H | backward H].
    w_in = jnp.concatenate(
        [jnp.concatenate([wih_f[g], wih_b[g]], axis=1) for g in range(4)], axis=1)
    b_in = jnp.concatenate(
        [jnp.concatenate([bf[g * H:(g + 1) * H], bb[g * H:(g + 1) * H]])
         for g in range(4)]).reshape(1, 8 * H)

    # Recurrent weights (2H, 8H): block-diagonal within each gate block.
    zero = jnp.zeros((H, H), jnp.float32)
    w_rec = jnp.concatenate(
        [jnp.concatenate(
            [jnp.concatenate([whh_f[g], zero], axis=1),      # rows = h_fwd
             jnp.concatenate([zero, whh_b[g]], axis=1)],     # rows = h_bwd
            axis=0)
         for g in range(4)], axis=1)

    # Dense (NT, 2H) split by direction, transposed for (H, NT) matmuls.
    wd = params["w_dense"]
    wdf = wd[:, :H].T                                                # (H, NT)
    wdb = wd[:, H:].T                                                # (H, NT)
    bd = params["b_dense"].reshape(1, NT)
    return w_in, b_in, w_rec, wdf, wdb, bd


# ---------------------------------------------------------------------------
# POSTagger forward
# ---------------------------------------------------------------------------
def pos_tagger_forward(params, x):
    """x: (T, B, H) float32.  Returns (output, (h_n, c_n)) matching PyTorch POSTagger."""
    T, B, H = x.shape
    NT = params["w_dense"].shape[0]
    w_in, b_in, w_rec, wdf, wdb, bd = _build_combined_weights(params, H)

    # Hoisted input projection: one GEMM for both directions and all timesteps.
    gx = (jnp.dot(x.reshape(T * B, H), w_in, preferred_element_type=jnp.float32)
          + b_in).reshape(T, B, 8 * H)

    kernel = functools.partial(_bilstm_dense_kernel, T=T, B=B, H=H)

    out, h_cat, c_cat = pl.pallas_call(
        kernel,
        out_shape=(
            jax.ShapeDtypeStruct((T, B, NT), jnp.float32),
            jax.ShapeDtypeStruct((B, 2 * H), jnp.float32),
            jax.ShapeDtypeStruct((B, 2 * H), jnp.float32),
        ),
        grid_spec=pltpu.PrefetchScalarGridSpec(
            num_scalar_prefetch=0,
            grid=(1,),
            in_specs=[
                pl.BlockSpec((T, B, 8 * H), lambda i: (0, 0, 0)),   # gx (VMEM resident)
                pl.BlockSpec((2 * H, 8 * H), lambda i: (0, 0)),     # W_rec
                pl.BlockSpec((H, NT), lambda i: (0, 0)),            # W_dense (fwd half)
                pl.BlockSpec((H, NT), lambda i: (0, 0)),            # W_dense (bwd half)
                pl.BlockSpec((1, NT), lambda i: (0, 0)),            # b_dense
            ],
            out_specs=[
                pl.BlockSpec((T, B, NT), lambda i: (0, 0, 0)),      # dense output
                pl.BlockSpec((B, 2 * H), lambda i: (0, 0)),         # h_n (concat layout)
                pl.BlockSpec((B, 2 * H), lambda i: (0, 0)),         # c_n (concat layout)
            ],
            scratch_shapes=[
                pltpu.VMEM((T, B, H), jnp.float32),                 # forward outputs
                pltpu.VMEM((T, B, H), jnp.float32),                 # backward outputs
            ],
        ),
        compiler_params=pltpu.CompilerParams(
            dimension_semantics=("arbitrary",)),
    )(gx, w_rec, wdf, wdb, bd)

    h_n = jnp.stack([h_cat[:, :H], h_cat[:, H:]], axis=0)            # (2, B, H)
    c_n = jnp.stack([c_cat[:, :H], c_cat[:, H:]], axis=0)            # (2, B, H)
    output = jnp.squeeze(out)                                        # matches torch .squeeze()
    return output, (h_n, c_n)


# ---------------------------------------------------------------------------
# Pure-JAX reference (for in-script correctness check).
# ---------------------------------------------------------------------------
def _reference_forward(params, x):
    T, B, H = x.shape

    def run_dir(x_seq, w_ih, w_hh, b_ih, b_hh):
        def cell(carry, xt):
            h, c = carry
            gates = xt @ w_ih.T + b_ih + h @ w_hh.T + b_hh
            i, f, g, o = jnp.split(gates, 4, axis=-1)
            i = jax.nn.sigmoid(i)
            f = jax.nn.sigmoid(f)
            g = jnp.tanh(g)
            o = jax.nn.sigmoid(o)
            c = f * c + i * g
            h = o * jnp.tanh(c)
            return (h, c), h

        init = (jnp.zeros((B, H), jnp.float32), jnp.zeros((B, H), jnp.float32))
        (hN, cN), ys = jax.lax.scan(cell, init, x_seq)
        return ys, hN, cN

    out_f, h_f, c_f = run_dir(x, params["w_ih_f"], params["w_hh_f"],
                              params["b_ih_f"], params["b_hh_f"])
    out_b_rev, h_b, c_b = run_dir(jnp.flip(x, 0), params["w_ih_b"], params["w_hh_b"],
                                  params["b_ih_b"], params["b_hh_b"])
    out_b = jnp.flip(out_b_rev, 0)
    y = jnp.concatenate([out_f, out_b], axis=-1)
    out = y @ params["w_dense"].T + params["b_dense"]
    return jnp.squeeze(out), (jnp.stack([h_f, h_b]), jnp.stack([c_f, c_b]))


# ---------------------------------------------------------------------------
# Deterministic parameter init (PyTorch-style uniform(-1/sqrt(H), 1/sqrt(H))).
# ---------------------------------------------------------------------------
def init_params(key, h_size, n_tokens):
    bound = 1.0 / math.sqrt(h_size)
    keys = jax.random.split(key, 10)
    u = lambda k, shape: jax.random.uniform(
        k, shape, dtype=jnp.float32, minval=-bound, maxval=bound)
    return {
        "w_ih_f": u(keys[0], (4 * h_size, h_size)),
        "w_hh_f": u(keys[1], (4 * h_size, h_size)),
        "b_ih_f": u(keys[2], (4 * h_size,)),
        "b_hh_f": u(keys[3], (4 * h_size,)),
        "w_ih_b": u(keys[4], (4 * h_size, h_size)),
        "w_hh_b": u(keys[5], (4 * h_size, h_size)),
        "b_ih_b": u(keys[6], (4 * h_size,)),
        "b_hh_b": u(keys[7], (4 * h_size,)),
        "w_dense": u(keys[8], (n_tokens, 2 * h_size)),
        "b_dense": u(keys[9], (n_tokens,)),
    }


if __name__ == "__main__":
    T, B, H, N_TOKENS = 8, 4, 32, 16

    key = jax.random.PRNGKey(0)
    k_param, k_input = jax.random.split(key)
    params = init_params(k_param, H, N_TOKENS)
    x = jax.random.normal(k_input, (T, B, H), dtype=jnp.float32)

    output, (h_n, c_n) = jax.jit(pos_tagger_forward)(params, x)
    jax.block_until_ready((output, h_n, c_n))

    assert output.shape == (T, B, N_TOKENS)
    assert h_n.shape == (2, B, H) and c_n.shape == (2, B, H)

    ref_out, (ref_h, ref_c) = jax.jit(_reference_forward)(params, x)
    jax.block_until_ready((ref_out, ref_h, ref_c))
    assert jnp.allclose(output, ref_out, rtol=2e-2, atol=2e-2)
    assert jnp.allclose(h_n, ref_h, rtol=2e-2, atol=2e-2)
    assert jnp.allclose(c_n, ref_c, rtol=2e-2, atol=2e-2)

    print("KERNEL_OK")
</pallas_src>

<mosaic_0001>
module attributes {stable_mosaic.version = 11 : i64} {
  func.func @_bilstm_dense_kernel(%arg0: i32, %arg1: memref<8x4x256xf32, #tpu.memory_space<vmem>>, %arg2: memref<64x256xf32, #tpu.memory_space<vmem>>, %arg3: memref<32x16xf32, #tpu.memory_space<vmem>>, %arg4: memref<32x16xf32, #tpu.memory_space<vmem>>, %arg5: memref<1x16xf32, #tpu.memory_space<vmem>>, %arg6: memref<8x4x16xf32, #tpu.memory_space<vmem>>, %arg7: memref<4x64xf32, #tpu.memory_space<vmem>>, %arg8: memref<4x64xf32, #tpu.memory_space<vmem>>, %arg9: memref<8x4x32xf32, #tpu.memory_space<vmem>>, %arg10: memref<8x4x32xf32, #tpu.memory_space<vmem>>) attributes {dimension_semantics = [#tpu.dimension_semantics<arbitrary>], iteration_bounds = array<i64: 1>, scalar_prefetch = 0 : i64, scratch_operands = 2 : i64, tpu.core_type = #tpu.core_type<tc>, window_params = [{pipeline_mode = #tpu.pipeline_mode<synchronous>, transform_indices = @transform_0, window_bounds = array<i64: 8, 4, 256>}, {pipeline_mode = #tpu.pipeline_mode<synchronous>, transform_indices = @transform_1, window_bounds = array<i64: 64, 256>}, {pipeline_mode = #tpu.pipeline_mode<synchronous>, transform_indices = @transform_2, window_bounds = array<i64: 32, 16>}, {pipeline_mode = #tpu.pipeline_mode<synchronous>, transform_indices = @transform_3, window_bounds = array<i64: 32, 16>}, {pipeline_mode = #tpu.pipeline_mode<synchronous>, transform_indices = @transform_4, window_bounds = array<i64: 1, 16>}, {pipeline_mode = #tpu.pipeline_mode<synchronous>, transform_indices = @transform_5, window_bounds = array<i64: 8, 4, 16>}, {pipeline_mode = #tpu.pipeline_mode<synchronous>, transform_indices = @transform_6, window_bounds = array<i64: 4, 64>}, {pipeline_mode = #tpu.pipeline_mode<synchronous>, transform_indices = @transform_7, window_bounds = array<i64: 4, 64>}]} {
    %c0 = arith.constant 0 : index
    %c0_0 = arith.constant 0 : index
    %0 = vector.load %arg2[%c0, %c0_0] : memref<64x256xf32, #tpu.memory_space<vmem>>, vector<64x256xf32>
    %1 = tpu.iota {dimensions = array<i32: 1>} : vector<4x256xi32>
    %c64_i32 = arith.constant 64 : i32
    %c0_i32 = arith.constant 0 : i32
    %2 = arith.cmpi eq, %c64_i32, %c0_i32 : i32
    %c1_i32 = arith.constant 1 : i32
    %3 = arith.select %2, %c1_i32, %c64_i32 : i32
    %4 = vector.broadcast %3 : i32 to vector<4x256xi32>
    %5 = arith.remsi %1, %4 : vector<4x256xi32>
    %c0_i32_1 = arith.constant 0 : i32
    %6 = vector.broadcast %c0_i32_1 : i32 to vector<4x256xi32>
    %7 = arith.cmpi ne, %5, %6 : vector<4x256xi32>
    %c0_i32_2 = arith.constant 0 : i32
    %8 = vector.broadcast %c0_i32_2 : i32 to vector<4x256xi32>
    %9 = arith.cmpi slt, %5, %8 : vector<4x256xi32>
    %c0_i32_3 = arith.constant 0 : i32
    %10 = arith.cmpi slt, %3, %c0_i32_3 : i32
    %11 = vector.broadcast %10 : i1 to vector<4x256xi1>
    %12 = vector.broadcast %11 : vector<4x256xi1> to vector<4x256xi1>
    %13 = arith.xori %9, %12 : vector<4x256xi1>
    %14 = arith.andi %13, %7 : vector<4x256xi1>
    %15 = vector.broadcast %3 : i32 to vector<4x256xi32>
    %16 = arith.addi %5, %15 : vector<4x256xi32>
    %17 = arith.select %14, %16, %5 : vector<4x256xi1>, vector<4x256xi32>
    %c32_i32 = arith.constant 32 : i32
    %18 = vector.broadcast %c32_i32 : i32 to vector<4x256xi32>
    %19 = arith.cmpi slt, %17, %18 : vector<4x256xi32>
    %cst = arith.constant 0.000000e+00 : f32
    %20 = vector.broadcast %cst : f32 to vector<4x64xf32>
    %c0_i32_4 = arith.constant 0 : i32
    %21 = arith.index_cast %c0_i32_4 : i32 to index
    %c0_5 = arith.constant 0 : index
    %c0_6 = arith.constant 0 : index
    %22 = vector.load %arg1[%21, %c0_5, %c0_6] : memref<8x4x256xf32, #tpu.memory_space<vmem>>, vector<1x4x256xf32>
    %23 = vector.shape_cast %22 : vector<1x4x256xf32> to vector<4x256xf32>
    %c7_i32 = arith.constant 7 : i32
    %24 = arith.subi %c7_i32, %c0_i32_4 : i32
    %25 = arith.index_cast %24 : i32 to index
    %c0_7 = arith.constant 0 : index
    %c0_8 = arith.constant 0 : index
    %26 = vector.load %arg1[%25, %c0_7, %c0_8] : memref<8x4x256xf32, #tpu.memory_space<vmem>>, vector<1x4x256xf32>
    %27 = vector.shape_cast %26 : vector<1x4x256xf32> to vector<4x256xf32>
    %28 = arith.select %19, %23, %27 : vector<4x256xi1>, vector<4x256xf32>
    %cst_9 = arith.constant dense<0.000000e+00> : vector<4x256xf32>
    %29 = tpu.matmul %20, %0, %cst_9 {dimension_numbers = #tpu.dot_dimension_numbers<[1], [0], [0], [1], [0, 0, 1, 1], [], []>} : vector<4x64xf32>, vector<64x256xf32>, vector<4x256xf32> -> vector<4x256xf32>
    %30 = arith.addf %28, %29 : vector<4x256xf32>
    %31 = vector.extract_strided_slice %30 {offsets = [0, 0], sizes = [4, 64], strides = [1, 1]} : vector<4x256xf32> to vector<4x64xf32>
    %32 = arith.negf %31 : vector<4x64xf32>
    %33 = math.exp %32 : vector<4x64xf32>
    %cst_10 = arith.constant 1.000000e+00 : f32
    %34 = vector.broadcast %cst_10 : f32 to vector<4x64xf32>
    %35 = arith.addf %34, %33 : vector<4x64xf32>
    %36 = arith.divf %34, %35 : vector<4x64xf32>
    %37 = vector.extract_strided_slice %30 {offsets = [0, 64], sizes = [4, 64], strides = [1, 1]} : vector<4x256xf32> to vector<4x64xf32>
    %38 = arith.negf %37 : vector<4x64xf32>
    %39 = math.exp %38 : vector<4x64xf32>
    %cst_11 = arith.constant 1.000000e+00 : f32
    %40 = vector.broadcast %cst_11 : f32 to vector<4x64xf32>
    %41 = arith.addf %40, %39 : vector<4x64xf32>
    %42 = arith.divf %40, %41 : vector<4x64xf32>
    %43 = vector.extract_strided_slice %30 {offsets = [0, 128], sizes = [4, 64], strides = [1, 1]} : vector<4x256xf32> to vector<4x64xf32>
    %44 = math.tanh %43 : vector<4x64xf32>
    %45 = vector.extract_strided_slice %30 {offsets = [0, 192], sizes = [4, 64], strides = [1, 1]} : vector<4x256xf32> to vector<4x64xf32>
    %46 = arith.negf %45 : vector<4x64xf32>
    %47 = math.exp %46 : vector<4x64xf32>
    %cst_12 = arith.constant 1.000000e+00 : f32
    %48 = vector.broadcast %cst_12 : f32 to vector<4x64xf32>
    %49 = arith.addf %48, %47 : vector<4x64xf32>
    %50 = arith.divf %48, %49 : vector<4x64xf32>
    %51 = arith.mulf %42, %20 : vector<4x64xf32>
    %52 = arith.mulf %36, %44 : vector<4x64xf32>
    %53 = arith.addf %51, %52 : vector<4x64xf32>
    %54 = math.tanh %53 : vector<4x64xf32>
    %55 = arith.mulf %50, %54 : vector<4x64xf32>
    %56 = vector.extract_strided_slice %55 {offsets = [0, 0], sizes = [4, 32], strides = [1, 1]} : vector<4x64xf32> to vector<4x32xf32>
    %57 = arith.index_cast %c0_i32_4 : i32 to index
    %c0_13 = arith.constant 0 : index
    %c0_14 = arith.constant 0 : index
    %58 = vector.load %arg9[%57, %c0_13, %c0_14] : memref<8x4x32xf32, #tpu.memory_space<vmem>>, vector<1x4x32xf32>
    %59 = vector.shape_cast %58 : vector<1x4x32xf32> to vector<4x32xf32>
    %60 = vector.shape_cast %56 : vector<4x32xf32> to vector<1x4x32xf32>
    tpu.vector_store %arg9[%57, %c0_13, %c0_14], %60 {strides = array<i32>} : memref<8x4x32xf32, #tpu.memory_space<vmem>>, vector<1x4x32xf32>,
    %61 = vector.extract_strided_slice %55 {offsets = [0, 32], sizes = [4, 32], strides = [1, 1]} : vector<4x64xf32> to vector<4x32xf32>
    %c7_i32_15 = arith.constant 7 : i32
    %62 = arith.subi %c7_i32_15, %c0_i32_4 : i32
    %63 = arith.index_cast %62 : i32 to index
    %c0_16 = arith.constant 0 : index
    %c0_17 = arith.constant 0 : index
    %64 = vector.load %arg10[%63, %c0_16, %c0_17] : memref<8x4x32xf32, #tpu.memory_space<vmem>>, vector<1x4x32xf32>
    %65 = vector.shape_cast %64 : vector<1x4x32xf32> to vector<4x32xf32>
    %66 = vector.shape_cast %61 : vector<4x32xf32> to vector<1x4x32xf32>
    tpu.vector_store %arg10[%63, %c0_16, %c0_17], %66 {strides = array<i32>} : memref<8x4x32xf32, #tpu.memory_space<vmem>>, vector<1x4x32xf32>,
    %c1_i32_18 = arith.constant 1 : i32
    %67 = arith.index_cast %c1_i32_18 : i32 to index
    %c0_19 = arith.constant 0 : index
    %c0_20 = arith.constant 0 : index
    %68 = vector.load %arg1[%67, %c0_19, %c0_20] : memref<8x4x256xf32, #tpu.memory_space<vmem>>, vector<1x4x256xf32>
    %69 = vector.shape_cast %68 : vector<1x4x256xf32> to vector<4x256xf32>
    %c7_i32_21 = arith.constant 7 : i32
    %70 = arith.subi %c7_i32_21, %c1_i32_18 : i32
    %71 = arith.index_cast %70 : i32 to index
    %c0_22 = arith.constant 0 : index
    %c0_23 = arith.constant 0 : index
    %72 = vector.load %arg1[%71, %c0_22, %c0_23] : memref<8x4x256xf32, #tpu.memory_space<vmem>>, vector<1x4x256xf32>
    %73 = vector.shape_cast %72 : vector<1x4x256xf32> to vector<4x256xf32>
    %74 = arith.select %19, %69, %73 : vector<4x256xi1>, vector<4x256xf32>
    %cst_24 = arith.constant dense<0.000000e+00> : vector<4x256xf32>
    %75 = tpu.matmul %55, %0, %cst_24 {dimension_numbers = #tpu.dot_dimension_numbers<[1], [0], [0], [1], [0, 0, 1, 1], [], []>} : vector<4x64xf32>, vector<64x256xf32>, vector<4x256xf32> -> vector<4x256xf32>
    %76 = arith.addf %74, %75 : vector<4x256xf32>
    %77 = vector.extract_strided_slice %76 {offsets = [0, 0], sizes = [4, 64], strides = [1, 1]} : vector<4x256xf32> to vector<4x64xf32>
    %78 = arith.negf %77 : vector<4x64xf32>
    %79 = math.exp %78 : vector<4x64xf32>
    %cst_25 = arith.constant 1.000000e+00 : f32
    %80 = vector.broadcast %cst_25 : f32 to vector<4x64xf32>
    %81 = arith.addf %80, %79 : vector<4x64xf32>
    %82 = arith.divf %80, %81 : vector<4x64xf32>
    %83 = vector.extract_strided_slice %76 {offsets = [0, 64], sizes = [4, 64], strides = [1, 1]} : vector<4x256xf32> to vector<4x64xf32>
    %84 = arith.negf %83 : vector<4x64xf32>
    %85 = math.exp %84 : vector<4x64xf32>
    %cst_26 = arith.constant 1.000000e+00 : f32
    %86 = vector.broadcast %cst_26 : f32 to vector<4x64xf32>
    %87 = arith.addf %86, %85 : vector<4x64xf32>
    %88 = arith.divf %86, %87 : vector<4x64xf32>
    %89 = vector.extract_strided_slice %76 {offsets = [0, 128], sizes = [4, 64], strides = [1, 1]} : vector<4x256xf32> to vector<4x64xf32>
    %90 = math.tanh %89 : vector<4x64xf32>
    %91 = vector.extract_strided_slice %76 {offsets = [0, 192], sizes = [4, 64], strides = [1, 1]} : vector<4x256xf32> to vector<4x64xf32>
    %92 = arith.negf %91 : vector<4x64xf32>
    %93 = math.exp %92 : vector<4x64xf32>
    %cst_27 = arith.constant 1.000000e+00 : f32
    %94 = vector.broadcast %cst_27 : f32 to vector<4x64xf32>
    %95 = arith.addf %94, %93 : vector<4x64xf32>
    %96 = arith.divf %94, %95 : vector<4x64xf32>
    %97 = arith.mulf %88, %53 : vector<4x64xf32>
    %98 = arith.mulf %82, %90 : vector<4x64xf32>
    %99 = arith.addf %97, %98 : vector<4x64xf32>
    %100 = math.tanh %99 : vector<4x64xf32>
    %101 = arith.mulf %96, %100 : vector<4x64xf32>
    %102 = vector.extract_strided_slice %101 {offsets = [0, 0], sizes = [4, 32], strides = [1, 1]} : vector<4x64xf32> to vector<4x32xf32>
    %103 = arith.index_cast %c1_i32_18 : i32 to index
    %c0_28 = arith.constant 0 : index
    %c0_29 = arith.constant 0 : index
    %104 = vector.load %arg9[%103, %c0_28, %c0_29] : memref<8x4x32xf32, #tpu.memory_space<vmem>>, vector<1x4x32xf32>
    %105 = vector.shape_cast %104 : vector<1x4x32xf32> to vector<4x32xf32>
    %106 = vector.shape_cast %102 : vector<4x32xf32> to vector<1x4x32xf32>
    tpu.vector_store %arg9[%103, %c0_28, %c0_29], %106 {strides = array<i32>} : memref<8x4x32xf32, #tpu.memory_space<vmem>>, vector<1x4x32xf32>,
    %107 = vector.extract_strided_slice %101 {offsets = [0, 32], sizes = [4, 32], strides = [1, 1]} : vector<4x64xf32> to vector<4x32xf32>
    %c7_i32_30 = arith.constant 7 : i32
    %108 = arith.subi %c7_i32_30, %c1_i32_18 : i32
    %109 = arith.index_cast %108 : i32 to index
    %c0_31 = arith.constant 0 : index
    %c0_32 = arith.constant 0 : index
    %110 = vector.load %arg10[%109, %c0_31, %c0_32] : memref<8x4x32xf32, #tpu.memory_space<vmem>>, vector<1x4x32xf32>
    %111 = vector.shape_cast %110 : vector<1x4x32xf32> to vector<4x32xf32>
    %112 = vector.shape_cast %107 : vector<4x32xf32> to vector<1x4x32xf32>
    tpu.vector_store %arg10[%109, %c0_31, %c0_32], %112 {strides = array<i32>} : memref<8x4x32xf32, #tpu.memory_space<vmem>>, vector<1x4x32xf32>,
    %c2_i32 = arith.constant 2 : i32
    %113 = arith.index_cast %c2_i32 : i32 to index
    %c0_33 = arith.constant 0 : index
    %c0_34 = arith.constant 0 : index
    %114 = vector.load %arg1[%113, %c0_33, %c0_34] : memref<8x4x256xf32, #tpu.memory_space<vmem>>, vector<1x4x256xf32>
    %115 = vector.shape_cast %114 : vector<1x4x256xf32> to vector<4x256xf32>
    %c7_i32_35 = arith.constant 7 : i32
    %116 = arith.subi %c7_i32_35, %c2_i32 : i32
    %117 = arith.index_cast %116 : i32 to index
    %c0_36 = arith.constant 0 : index
    %c0_37 = arith.constant 0 : index
    %118 = vector.load %arg1[%117, %c0_36, %c0_37] : memref<8x4x256xf32, #tpu.memory_space<vmem>>, vector<1x4x256xf32>
    %119 = vector.shape_cast %118 : vector<1x4x256xf32> to vector<4x256xf32>
    %120 = arith.select %19, %115, %119 : vector<4x256xi1>, vector<4x256xf32>
    %cst_38 = arith.constant dense<0.000000e+00> : vector<4x256xf32>
    %121 = tpu.matmul %101, %0, %cst_38 {dimension_numbers = #tpu.dot_dimension_numbers<[1], [0], [0], [1], [0, 0, 1, 1], [], []>} : vector<4x64xf32>, vector<64x256xf32>, vector<4x256xf32> -> vector<4x256xf32>
    %122 = arith.addf %120, %121 : vector<4x256xf32>
    %123 = vector.extract_strided_slice %122 {offsets = [0, 0], sizes = [4, 64], strides = [1, 1]} : vector<4x256xf32> to vector<4x64xf32>
    %124 = arith.negf %123 : vector<4x64xf32>
    %125 = math.exp %124 : vector<4x64xf32>
    %cst_39 = arith.constant 1.000000e+00 : f32
    %126 = vector.broadcast %cst_39 : f32 to vector<4x64xf32>
    %127 = arith.addf %126, %125 : vector<4x64xf32>
    %128 = arith.divf %126, %127 : vector<4x64xf32>
    %129 = vector.extract_strided_slice %122 {offsets = [0, 64], sizes = [4, 64], strides = [1, 1]} : vector<4x256xf32> to vector<4x64xf32>
    %130 = arith.negf %129 : vector<4x64xf32>
    %131 = math.exp %130 : vector<4x64xf32>
    %cst_40 = arith.constant 1.000000e+00 : f32
    %132 = vector.broadcast %cst_40 : f32 to vector<4x64xf32>
    %133 = arith.addf %132, %131 : vector<4x64xf32>
    %134 = arith.divf %132, %133 : vector<4x64xf32>
    %135 = vector.extract_strided_slice %122 {offsets = [0, 128], sizes = [4, 64], strides = [1, 1]} : vector<4x256xf32> to vector<4x64xf32>
    %136 = math.tanh %135 : vector<4x64xf32>
    %137 = vector.extract_strided_slice %122 {offsets = [0, 192], sizes = [4, 64], strides = [1, 1]} : vector<4x256xf32> to vector<4x64xf32>
    %138 = arith.negf %137 : vector<4x64xf32>
    %139 = math.exp %138 : vector<4x64xf32>
    %cst_41 = arith.constant 1.000000e+00 : f32
    %140 = vector.broadcast %cst_41 : f32 to vector<4x64xf32>
    %141 = arith.addf %140, %139 : vector<4x64xf32>
    %142 = arith.divf %140, %141 : vector<4x64xf32>
    %143 = arith.mulf %134, %99 : vector<4x64xf32>
    %144 = arith.mulf %128, %136 : vector<4x64xf32>
    %145 = arith.addf %143, %144 : vector<4x64xf32>
    %146 = math.tanh %145 : vector<4x64xf32>
    %147 = arith.mulf %142, %146 : vector<4x64xf32>
    %148 = vector.extract_strided_slice %147 {offsets = [0, 0], sizes = [4, 32], strides = [1, 1]} : vector<4x64xf32> to vector<4x32xf32>
    %149 = arith.index_cast %c2_i32 : i32 to index
    %c0_42 = arith.constant 0 : index
    %c0_43 = arith.constant 0 : index
    %150 = vector.load %arg9[%149, %c0_42, %c0_43] : memref<8x4x32xf32, #tpu.memory_space<vmem>>, vector<1x4x32xf32>
    %151 = vector.shape_cast %150 : vector<1x4x32xf32> to vector<4x32xf32>
    %152 = vector.shape_cast %148 : vector<4x32xf32> to vector<1x4x32xf32>
    tpu.vector_store %arg9[%149, %c0_42, %c0_43], %152 {strides = array<i32>} : memref<8x4x32xf32, #tpu.memory_space<vmem>>, vector<1x4x32xf32>,
    %153 = vector.extract_strided_slice %147 {offsets = [0, 32], sizes = [4, 32], strides = [1, 1]} : vector<4x64xf32> to vector<4x32xf32>
    %c7_i32_44 = arith.constant 7 : i32
    %154 = arith.subi %c7_i32_44, %c2_i32 : i32
    %155 = arith.index_cast %154 : i32 to index
    %c0_45 = arith.constant 0 : index
    %c0_46 = arith.constant 0 : index
    %156 = vector.load %arg10[%155, %c0_45, %c0_46] : memref<8x4x32xf32, #tpu.memory_space<vmem>>, vector<1x4x32xf32>
    %157 = vector.shape_cast %156 : vector<1x4x32xf32> to vector<4x32xf32>
    %158 = vector.shape_cast %153 : vector<4x32xf32> to vector<1x4x32xf32>
    tpu.vector_store %arg10[%155, %c0_45, %c0_46], %158 {strides = array<i32>} : memref<8x4x32xf32, #tpu.memory_space<vmem>>, vector<1x4x32xf32>,
    %c3_i32 = arith.constant 3 : i32
    %159 = arith.index_cast %c3_i32 : i32 to index
    %c0_47 = arith.constant 0 : index
    %c0_48 = arith.constant 0 : index
    %160 = vector.load %arg1[%159, %c0_47, %c0_48] : memref<8x4x256xf32, #tpu.memory_space<vmem>>, vector<1x4x256xf32>
    %161 = vector.shape_cast %160 : vector<1x4x256xf32> to vector<4x256xf32>
    %c7_i32_49 = arith.constant 7 : i32
    %162 = arith.subi %c7_i32_49, %c3_i32 : i32
    %163 = arith.index_cast %162 : i32 to index
    %c0_50 = arith.constant 0 : index
    %c0_51 = arith.constant 0 : index
    %164 = vector.load %arg1[%163, %c0_50, %c0_51] : memref<8x4x256xf32, #tpu.memory_space<vmem>>, vector<1x4x256xf32>
    %165 = vector.shape_cast %164 : vector<1x4x256xf32> to vector<4x256xf32>
    %166 = arith.select %19, %161, %165 : vector<4x256xi1>, vector<4x256xf32>
    %cst_52 = arith.constant dense<0.000000e+00> : vector<4x256xf32>
    %167 = tpu.matmul %147, %0, %cst_52 {dimension_numbers = #tpu.dot_dimension_numbers<[1], [0], [0], [1], [0, 0, 1, 1], [], []>} : vector<4x64xf32>, vector<64x256xf32>, vector<4x256xf32> -> vector<4x256xf32>
    %168 = arith.addf %166, %167 : vector<4x256xf32>
    %169 = vector.extract_strided_slice %168 {offsets = [0, 0], sizes = [4, 64], strides = [1, 1]} : vector<4x256xf32> to vector<4x64xf32>
    %170 = arith.negf %169 : vector<4x64xf32>
    %171 = math.exp %170 : vector<4x64xf32>
    %cst_53 = arith.constant 1.000000e+00 : f32
    %172 = vector.broadcast %cst_53 : f32 to vector<4x64xf32>
    %173 = arith.addf %172, %171 : vector<4x64xf32>
    %174 = arith.divf %172, %173 : vector<4x64xf32>
    %175 = vector.extract_strided_slice %168 {offsets = [0, 64], sizes = [4, 64], strides = [1, 1]} : vector<4x256xf32> to vector<4x64xf32>
    %176 = arith.negf %175 : vector<4x64xf32>
    %177 = math.exp %176 : vector<4x64xf32>
    %cst_54 = arith.constant 1.000000e+00 : f32
    %178 = vector.broadcast %cst_54 : f32 to vector<4x64xf32>
    %179 = arith.addf %178, %177 : vector<4x64xf32>
    %180 = arith.divf %178, %179 : vector<4x64xf32>
    %181 = vector.extract_strided_slice %168 {offsets = [0, 128], sizes = [4, 64], strides = [1, 1]} : vector<4x256xf32> to vector<4x64xf32>
    %182 = math.tanh %181 : vector<4x64xf32>
    %183 = vector.extract_strided_slice %168 {offsets = [0, 192], sizes = [4, 64], strides = [1, 1]} : vector<4x256xf32> to vector<4x64xf32>
    %184 = arith.negf %183 : vector<4x64xf32>
    %185 = math.exp %184 : vector<4x64xf32>
    %cst_55 = arith.constant 1.000000e+00 : f32
    %186 = vector.broadcast %cst_55 : f32 to vector<4x64xf32>
    %187 = arith.addf %186, %185 : vector<4x64xf32>
    %188 = arith.divf %186, %187 : vector<4x64xf32>
    %189 = arith.mulf %180, %145 : vector<4x64xf32>
    %190 = arith.mulf %174, %182 : vector<4x64xf32>
    %191 = arith.addf %189, %190 : vector<4x64xf32>
    %192 = math.tanh %191 : vector<4x64xf32>
    %193 = arith.mulf %188, %192 : vector<4x64xf32>
    %194 = vector.extract_strided_slice %193 {offsets = [0, 0], sizes = [4, 32], strides = [1, 1]} : vector<4x64xf32> to vector<4x32xf32>
    %195 = arith.index_cast %c3_i32 : i32 to index
    %c0_56 = arith.constant 0 : index
    %c0_57 = arith.constant 0 : index
    %196 = vector.load %arg9[%195, %c0_56, %c0_57] : memref<8x4x32xf32, #tpu.memory_space<vmem>>, vector<1x4x32xf32>
    %197 = vector.shape_cast %196 : vector<1x4x32xf32> to vector<4x32xf32>
    %198 = vector.shape_cast %194 : vector<4x32xf32> to vector<1x4x32xf32>
    tpu.vector_store %arg9[%195, %c0_56, %c0_57], %198 {strides = array<i32>} : memref<8x4x32xf32, #tpu.memory_space<vmem>>, vector<1x4x32xf32>,
    %199 = vector.extract_strided_slice %193 {offsets = [0, 32], sizes = [4, 32], strides = [1, 1]} : vector<4x64xf32> to vector<4x32xf32>
    %c7_i32_58 = arith.constant 7 : i32
    %200 = arith.subi %c7_i32_58, %c3_i32 : i32
    %201 = arith.index_cast %200 : i32 to index
    %c0_59 = arith.constant 0 : index
    %c0_60 = arith.constant 0 : index
    %202 = vector.load %arg10[%201, %c0_59, %c0_60] : memref<8x4x32xf32, #tpu.memory_space<vmem>>, vector<1x4x32xf32>
    %203 = vector.shape_cast %202 : vector<1x4x32xf32> to vector<4x32xf32>
    %204 = vector.shape_cast %199 : vector<4x32xf32> to vector<1x4x32xf32>
    tpu.vector_store %arg10[%201, %c0_59, %c0_60], %204 {strides = array<i32>} : memref<8x4x32xf32, #tpu.memory_space<vmem>>, vector<1x4x32xf32>,
    %c4_i32 = arith.constant 4 : i32
    %205 = arith.index_cast %c4_i32 : i32 to index
    %c0_61 = arith.constant 0 : index
    %c0_62 = arith.constant 0 : index
    %206 = vector.load %arg1[%205, %c0_61, %c0_62] : memref<8x4x256xf32, #tpu.memory_space<vmem>>, vector<1x4x256xf32>
    %207 = vector.shape_cast %206 : vector<1x4x256xf32> to vector<4x256xf32>
    %c7_i32_63 = arith.constant 7 : i32
    %208 = arith.subi %c7_i32_63, %c4_i32 : i32
    %209 = arith.index_cast %208 : i32 to index
    %c0_64 = arith.constant 0 : index
    %c0_65 = arith.constant 0 : index
    %210 = vector.load %arg1[%209, %c0_64, %c0_65] : memref<8x4x256xf32, #tpu.memory_space<vmem>>, vector<1x4x256xf32>
    %211 = vector.shape_cast %210 : vector<1x4x256xf32> to vector<4x256xf32>
    %212 = arith.select %19, %207, %211 : vector<4x256xi1>, vector<4x256xf32>
    %cst_66 = arith.constant dense<0.000000e+00> : vector<4x256xf32>
    %213 = tpu.matmul %193, %0, %cst_66 {dimension_numbers = #tpu.dot_dimension_numbers<[1], [0], [0], [1], [0, 0, 1, 1], [], []>} : vector<4x64xf32>, vector<64x256xf32>, vector<4x256xf32> -> vector<4x256xf32>
    %214 = arith.addf %212, %213 : vector<4x256xf32>
    %215 = vector.extract_strided_slice %214 {offsets = [0, 0], sizes = [4, 64], strides = [1, 1]} : vector<4x256xf32> to vector<4x64xf32>
    %216 = arith.negf %215 : vector<4x64xf32>
    %217 = math.exp %216 : vector<4x64xf32>
    %cst_67 = arith.constant 1.000000e+00 : f32
    %218 = vector.broadcast %cst_67 : f32 to vector<4x64xf32>
    %219 = arith.addf %218, %217 : vector<4x64xf32>
    %220 = arith.divf %218, %219 : vector<4x64xf32>
    %221 = vector.extract_strided_slice %214 {offsets = [0, 64], sizes = [4, 64], strides = [1, 1]} : vector<4x256xf32> to vector<4x64xf32>
    %222 = arith.negf %221 : vector<4x64xf32>
    %223 = math.exp %222 : vector<4x64xf32>
    %cst_68 = arith.constant 1.000000e+00 : f32
    %224 = vector.broadcast %cst_68 : f32 to vector<4x64xf32>
    %225 = arith.addf %224, %223 : vector<4x64xf32>
    %226 = arith.divf %224, %225 : vector<4x64xf32>
    %227 = vector.extract_strided_slice %214 {offsets = [0, 128], sizes = [4, 64], strides = [1, 1]} : vector<4x256xf32> to vector<4x64xf32>
    %228 = math.tanh %227 : vector<4x64xf32>
    %229 = vector.extract_strided_slice %214 {offsets = [0, 192], sizes = [4, 64], strides = [1, 1]} : vector<4x256xf32> to vector<4x64xf32>
    %230 = arith.negf %229 : vector<4x64xf32>
    %231 = math.exp %230 : vector<4x64xf32>
    %cst_69 = arith.constant 1.000000e+00 : f32
    %232 = vector.broadcast %cst_69 : f32 to vector<4x64xf32>
    %233 = arith.addf %232, %231 : vector<4x64xf32>
    %234 = arith.divf %232, %233 : vector<4x64xf32>
    %235 = arith.mulf %226, %191 : vector<4x64xf32>
    %236 = arith.mulf %220, %228 : vector<4x64xf32>
    %237 = arith.addf %235, %236 : vector<4x64xf32>
    %238 = math.tanh %237 : vector<4x64xf32>
    %239 = arith.mulf %234, %238 : vector<4x64xf32>
    %240 = vector.extract_strided_slice %239 {offsets = [0, 0], sizes = [4, 32], strides = [1, 1]} : vector<4x64xf32> to vector<4x32xf32>
    %241 = arith.index_cast %c4_i32 : i32 to index
    %c0_70 = arith.constant 0 : index
    %c0_71 = arith.constant 0 : index
    %242 = vector.load %arg9[%241, %c0_70, %c0_71] : memref<8x4x32xf32, #tpu.memory_space<vmem>>, vector<1x4x32xf32>
    %243 = vector.shape_cast %242 : vector<1x4x32xf32> to vector<4x32xf32>
    %244 = vector.shape_cast %240 : vector<4x32xf32> to vector<1x4x32xf32>
    tpu.vector_store %arg9[%241, %c0_70, %c0_71], %244 {strides = array<i32>} : memref<8x4x32xf32, #tpu.memory_space<vmem>>, vector<1x4x32xf32>,
    %245 = vector.extract_strided_slice %239 {offsets = [0, 32], sizes = [4, 32], strides = [1, 1]} : vector<4x64xf32> to vector<4x32xf32>
    %c7_i32_72 = arith.constant 7 : i32
    %246 = arith.subi %c7_i32_72, %c4_i32 : i32
    %247 = arith.index_cast %246 : i32 to index
    %c0_73 = arith.constant 0 : index
    %c0_74 = arith.constant 0 : index
    %248 = vector.load %arg10[%247, %c0_73, %c0_74] : memref<8x4x32xf32, #tpu.memory_space<vmem>>, vector<1x4x32xf32>
    %249 = vector.shape_cast %248 : vector<1x4x32xf32> to vector<4x32xf32>
    %250 = vector.shape_cast %245 : vector<4x32xf32> to vector<1x4x32xf32>
    tpu.vector_store %arg10[%247, %c0_73, %c0_74], %250 {strides = array<i32>} : memref<8x4x32xf32, #tpu.memory_space<vmem>>, vector<1x4x32xf32>,
    %c5_i32 = arith.constant 5 : i32
    %251 = arith.index_cast %c5_i32 : i32 to index
    %c0_75 = arith.constant 0 : index
    %c0_76 = arith.constant 0 : index
    %252 = vector.load %arg1[%251, %c0_75, %c0_76] : memref<8x4x256xf32, #tpu.memory_space<vmem>>, vector<1x4x256xf32>
    %253 = vector.shape_cast %252 : vector<1x4x256xf32> to vector<4x256xf32>
    %c7_i32_77 = arith.constant 7 : i32
    %254 = arith.subi %c7_i32_77, %c5_i32 : i32
    %255 = arith.index_cast %254 : i32 to index
    %c0_78 = arith.constant 0 : index
    %c0_79 = arith.constant 0 : index
    %256 = vector.load %arg1[%255, %c0_78, %c0_79] : memref<8x4x256xf32, #tpu.memory_space<vmem>>, vector<1x4x256xf32>
    %257 = vector.shape_cast %256 : vector<1x4x256xf32> to vector<4x256xf32>
    %258 = arith.select %19, %253, %257 : vector<4x256xi1>, vector<4x256xf32>
    %cst_80 = arith.constant dense<0.000000e+00> : vector<4x256xf32>
    %259 = tpu.matmul %239, %0, %cst_80 {dimension_numbers = #tpu.dot_dimension_numbers<[1], [0], [0], [1], [0, 0, 1, 1], [], []>} : vector<4x64xf32>, vector<64x256xf32>, vector<4x256xf32> -> vector<4x256xf32>
    %260 = arith.addf %258, %259 : vector<4x256xf32>
    %261 = vector.extract_strided_slice %260 {offsets = [0, 0], sizes = [4, 64], strides = [1, 1]} : vector<4x256xf32> to vector<4x64xf32>
    %262 = arith.negf %261 : vector<4x64xf32>
    %263 = math.exp %262 : vector<4x64xf32>
    %cst_81 = arith.constant 1.000000e+00 : f32
    %264 = vector.broadcast %cst_81 : f32 to vector<4x64xf32>
    %265 = arith.addf %264, %263 : vector<4x64xf32>
    %266 = arith.divf %264, %265 : vector<4x64xf32>
    %267 = vector.extract_strided_slice %260 {offsets = [0, 64], sizes = [4, 64], strides = [1, 1]} : vector<4x256xf32> to vector<4x64xf32>
    %268 = arith.negf %267 : vector<4x64xf32>
    %269 = math.exp %268 : vector<4x64xf32>
    %cst_82 = arith.constant 1.000000e+00 : f32
    %270 = vector.broadcast %cst_82 : f32 to vector<4x64xf32>
    %271 = arith.addf %270, %269 : vector<4x64xf32>
    %272 = arith.divf %270, %271 : vector<4x64xf32>
    %273 = vector.extract_strided_slice %260 {offsets = [0, 128], sizes = [4, 64], strides = [1, 1]} : vector<4x256xf32> to vector<4x64xf32>
    %274 = math.tanh %273 : vector<4x64xf32>
    %275 = vector.extract_strided_slice %260 {offsets = [0, 192], sizes = [4, 64], strides = [1, 1]} : vector<4x256xf32> to vector<4x64xf32>
    %276 = arith.negf %275 : vector<4x64xf32>
    %277 = math.exp %276 : vector<4x64xf32>
    %cst_83 = arith.constant 1.000000e+00 : f32
    %278 = vector.broadcast %cst_83 : f32 to vector<4x64xf32>
    %279 = arith.addf %278, %277 : vector<4x64xf32>
    %280 = arith.divf %278, %279 : vector<4x64xf32>
    %281 = arith.mulf %272, %237 : vector<4x64xf32>
    %282 = arith.mulf %266, %274 : vector<4x64xf32>
    %283 = arith.addf %281, %282 : vector<4x64xf32>
    %284 = math.tanh %283 : vector<4x64xf32>
    %285 = arith.mulf %280, %284 : vector<4x64xf32>
    %286 = vector.extract_strided_slice %285 {offsets = [0, 0], sizes = [4, 32], strides = [1, 1]} : vector<4x64xf32> to vector<4x32xf32>
    %287 = arith.index_cast %c5_i32 : i32 to index
    %c0_84 = arith.constant 0 : index
    %c0_85 = arith.constant 0 : index
    %288 = vector.load %arg9[%287, %c0_84, %c0_85] : memref<8x4x32xf32, #tpu.memory_space<vmem>>, vector<1x4x32xf32>
    %289 = vector.shape_cast %288 : vector<1x4x32xf32> to vector<4x32xf32>
    %290 = vector.shape_cast %286 : vector<4x32xf32> to vector<1x4x32xf32>
    tpu.vector_store %arg9[%287, %c0_84, %c0_85], %290 {strides = array<i32>} : memref<8x4x32xf32, #tpu.memory_space<vmem>>, vector<1x4x32xf32>,
    %291 = vector.extract_strided_slice %285 {offsets = [0, 32], sizes = [4, 32], strides = [1, 1]} : vector<4x64xf32> to vector<4x32xf32>
    %c7_i32_86 = arith.constant 7 : i32
    %292 = arith.subi %c7_i32_86, %c5_i32 : i32
    %293 = arith.index_cast %292 : i32 to index
    %c0_87 = arith.constant 0 : index
    %c0_88 = arith.constant 0 : index
    %294 = vector.load %arg10[%293, %c0_87, %c0_88] : memref<8x4x32xf32, #tpu.memory_space<vmem>>, vector<1x4x32xf32>
    %295 = vector.shape_cast %294 : vector<1x4x32xf32> to vector<4x32xf32>
    %296 = vector.shape_cast %291 : vector<4x32xf32> to vector<1x4x32xf32>
    tpu.vector_store %arg10[%293, %c0_87, %c0_88], %296 {strides = array<i32>} : memref<8x4x32xf32, #tpu.memory_space<vmem>>, vector<1x4x32xf32>,
    %c6_i32 = arith.constant 6 : i32
    %297 = arith.index_cast %c6_i32 : i32 to index
    %c0_89 = arith.constant 0 : index
    %c0_90 = arith.constant 0 : index
    %298 = vector.load %arg1[%297, %c0_89, %c0_90] : memref<8x4x256xf32, #tpu.memory_space<vmem>>, vector<1x4x256xf32>
    %299 = vector.shape_cast %298 : vector<1x4x256xf32> to vector<4x256xf32>
    %c7_i32_91 = arith.constant 7 : i32
    %300 = arith.subi %c7_i32_91, %c6_i32 : i32
    %301 = arith.index_cast %300 : i32 to index
    %c0_92 = arith.constant 0 : index
    %c0_93 = arith.constant 0 : index
    %302 = vector.load %arg1[%301, %c0_92, %c0_93] : memref<8x4x256xf32, #tpu.memory_space<vmem>>, vector<1x4x256xf32>
    %303 = vector.shape_cast %302 : vector<1x4x256xf32> to vector<4x256xf32>
    %304 = arith.select %19, %299, %303 : vector<4x256xi1>, vector<4x256xf32>
    %cst_94 = arith.constant dense<0.000000e+00> : vector<4x256xf32>
    %305 = tpu.matmul %285, %0, %cst_94 {dimension_numbers = #tpu.dot_dimension_numbers<[1], [0], [0], [1], [0, 0, 1, 1], [], []>} : vector<4x64xf32>, vector<64x256xf32>, vector<4x256xf32> -> vector<4x256xf32>
    %306 = arith.addf %304, %305 : vector<4x256xf32>
    %307 = vector.extract_strided_slice %306 {offsets = [0, 0], sizes = [4, 64], strides = [1, 1]} : vector<4x256xf32> to vector<4x64xf32>
    %308 = arith.negf %307 : vector<4x64xf32>
    %309 = math.exp %308 : vector<4x64xf32>
    %cst_95 = arith.constant 1.000000e+00 : f32
    %310 = vector.broadcast %cst_95 : f32 to vector<4x64xf32>
    %311 = arith.addf %310, %309 : vector<4x64xf32>
    %312 = arith.divf %310, %311 : vector<4x64xf32>
    %313 = vector.extract_strided_slice %306 {offsets = [0, 64], sizes = [4, 64], strides = [1, 1]} : vector<4x256xf32> to vector<4x64xf32>
    %314 = arith.negf %313 : vector<4x64xf32>
    %315 = math.exp %314 : vector<4x64xf32>
    %cst_96 = arith.constant 1.000000e+00 : f32
    %316 = vector.broadcast %cst_96 : f32 to vector<4x64xf32>
    %317 = arith.addf %316, %315 : vector<4x64xf32>
    %318 = arith.divf %316, %317 : vector<4x64xf32>
    %319 = vector.extract_strided_slice %306 {offsets = [0, 128], sizes = [4, 64], strides = [1, 1]} : vector<4x256xf32> to vector<4x64xf32>
    %320 = math.tanh %319 : vector<4x64xf32>
    %321 = vector.extract_strided_slice %306 {offsets = [0, 192], sizes = [4, 64], strides = [1, 1]} : vector<4x256xf32> to vector<4x64xf32>
    %322 = arith.negf %321 : vector<4x64xf32>
    %323 = math.exp %322 : vector<4x64xf32>
    %cst_97 = arith.constant 1.000000e+00 : f32
    %324 = vector.broadcast %cst_97 : f32 to vector<4x64xf32>
    %325 = arith.addf %324, %323 : vector<4x64xf32>
    %326 = arith.divf %324, %325 : vector<4x64xf32>
    %327 = arith.mulf %318, %283 : vector<4x64xf32>
    %328 = arith.mulf %312, %320 : vector<4x64xf32>
    %329 = arith.addf %327, %328 : vector<4x64xf32>
    %330 = math.tanh %329 : vector<4x64xf32>
    %331 = arith.mulf %326, %330 : vector<4x64xf32>
    %332 = vector.extract_strided_slice %331 {offsets = [0, 0], sizes = [4, 32], strides = [1, 1]} : vector<4x64xf32> to vector<4x32xf32>
    %333 = arith.index_cast %c6_i32 : i32 to index
    %c0_98 = arith.constant 0 : index
    %c0_99 = arith.constant 0 : index
    %334 = vector.load %arg9[%333, %c0_98, %c0_99] : memref<8x4x32xf32, #tpu.memory_space<vmem>>, vector<1x4x32xf32>
    %335 = vector.shape_cast %334 : vector<1x4x32xf32> to vector<4x32xf32>
    %336 = vector.shape_cast %332 : vector<4x32xf32> to vector<1x4x32xf32>
    tpu.vector_store %arg9[%333, %c0_98, %c0_99], %336 {strides = array<i32>} : memref<8x4x32xf32, #tpu.memory_space<vmem>>, vector<1x4x32xf32>,
    %337 = vector.extract_strided_slice %331 {offsets = [0, 32], sizes = [4, 32], strides = [1, 1]} : vector<4x64xf32> to vector<4x32xf32>
    %c7_i32_100 = arith.constant 7 : i32
    %338 = arith.subi %c7_i32_100, %c6_i32 : i32
    %339 = arith.index_cast %338 : i32 to index
    %c0_101 = arith.constant 0 : index
    %c0_102 = arith.constant 0 : index
    %340 = vector.load %arg10[%339, %c0_101, %c0_102] : memref<8x4x32xf32, #tpu.memory_space<vmem>>, vector<1x4x32xf32>
    %341 = vector.shape_cast %340 : vector<1x4x32xf32> to vector<4x32xf32>
    %342 = vector.shape_cast %337 : vector<4x32xf32> to vector<1x4x32xf32>
    tpu.vector_store %arg10[%339, %c0_101, %c0_102], %342 {strides = array<i32>} : memref<8x4x32xf32, #tpu.memory_space<vmem>>, vector<1x4x32xf32>,
    %c7_i32_103 = arith.constant 7 : i32
    %343 = arith.index_cast %c7_i32_103 : i32 to index
    %c0_104 = arith.constant 0 : index
    %c0_105 = arith.constant 0 : index
    %344 = vector.load %arg1[%343, %c0_104, %c0_105] : memref<8x4x256xf32, #tpu.memory_space<vmem>>, vector<1x4x256xf32>
    %345 = vector.shape_cast %344 : vector<1x4x256xf32> to vector<4x256xf32>
    %c7_i32_106 = arith.constant 7 : i32
    %346 = arith.subi %c7_i32_106, %c7_i32_103 : i32
    %347 = arith.index_cast %346 : i32 to index
    %c0_107 = arith.constant 0 : index
    %c0_108 = arith.constant 0 : index
    %348 = vector.load %arg1[%347, %c0_107, %c0_108] : memref<8x4x256xf32, #tpu.memory_space<vmem>>, vector<1x4x256xf32>
    %349 = vector.shape_cast %348 : vector<1x4x256xf32> to vector<4x256xf32>
    %350 = arith.select %19, %345, %349 : vector<4x256xi1>, vector<4x256xf32>
    %cst_109 = arith.constant dense<0.000000e+00> : vector<4x256xf32>
    %351 = tpu.matmul %331, %0, %cst_109 {dimension_numbers = #tpu.dot_dimension_numbers<[1], [0], [0], [1], [0, 0, 1, 1], [], []>} : vector<4x64xf32>, vector<64x256xf32>, vector<4x256xf32> -> vector<4x256xf32>
    %352 = arith.addf %350, %351 : vector<4x256xf32>
    %353 = vector.extract_strided_slice %352 {offsets = [0, 0], sizes = [4, 64], strides = [1, 1]} : vector<4x256xf32> to vector<4x64xf32>
    %354 = arith.negf %353 : vector<4x64xf32>
    %355 = math.exp %354 : vector<4x64xf32>
    %cst_110 = arith.constant 1.000000e+00 : f32
    %356 = vector.broadcast %cst_110 : f32 to vector<4x64xf32>
    %357 = arith.addf %356, %355 : vector<4x64xf32>
    %358 = arith.divf %356, %357 : vector<4x64xf32>
    %359 = vector.extract_strided_slice %352 {offsets = [0, 64], sizes = [4, 64], strides = [1, 1]} : vector<4x256xf32> to vector<4x64xf32>
    %360 = arith.negf %359 : vector<4x64xf32>
    %361 = math.exp %360 : vector<4x64xf32>
    %cst_111 = arith.constant 1.000000e+00 : f32
    %362 = vector.broadcast %cst_111 : f32 to vector<4x64xf32>
    %363 = arith.addf %362, %361 : vector<4x64xf32>
    %364 = arith.divf %362, %363 : vector<4x64xf32>
    %365 = vector.extract_strided_slice %352 {offsets = [0, 128], sizes = [4, 64], strides = [1, 1]} : vector<4x256xf32> to vector<4x64xf32>
    %366 = math.tanh %365 : vector<4x64xf32>
    %367 = vector.extract_strided_slice %352 {offsets = [0, 192], sizes = [4, 64], strides = [1, 1]} : vector<4x256xf32> to vector<4x64xf32>
    %368 = arith.negf %367 : vector<4x64xf32>
    %369 = math.exp %368 : vector<4x64xf32>
    %cst_112 = arith.constant 1.000000e+00 : f32
    %370 = vector.broadcast %cst_112 : f32 to vector<4x64xf32>
    %371 = arith.addf %370, %369 : vector<4x64xf32>
    %372 = arith.divf %370, %371 : vector<4x64xf32>
    %373 = arith.mulf %364, %329 : vector<4x64xf32>
    %374 = arith.mulf %358, %366 : vector<4x64xf32>
    %375 = arith.addf %373, %374 : vector<4x64xf32>
    %376 = math.tanh %375 : vector<4x64xf32>
    %377 = arith.mulf %372, %376 : vector<4x64xf32>
    %378 = vector.extract_strided_slice %377 {offsets = [0, 0], sizes = [4, 32], strides = [1, 1]} : vector<4x64xf32> to vector<4x32xf32>
    %379 = arith.index_cast %c7_i32_103 : i32 to index
    %c0_113 = arith.constant 0 : index
    %c0_114 = arith.constant 0 : index
    %380 = vector.load %arg9[%379, %c0_113, %c0_114] : memref<8x4x32xf32, #tpu.memory_space<vmem>>, vector<1x4x32xf32>
    %381 = vector.shape_cast %380 : vector<1x4x32xf32> to vector<4x32xf32>
    %382 = vector.shape_cast %378 : vector<4x32xf32> to vector<1x4x32xf32>
    tpu.vector_store %arg9[%379, %c0_113, %c0_114], %382 {strides = array<i32>} : memref<8x4x32xf32, #tpu.memory_space<vmem>>, vector<1x4x32xf32>,
    %383 = vector.extract_strided_slice %377 {offsets = [0, 32], sizes = [4, 32], strides = [1, 1]} : vector<4x64xf32> to vector<4x32xf32>
    %c7_i32_115 = arith.constant 7 : i32
    %384 = arith.subi %c7_i32_115, %c7_i32_103 : i32
    %385 = arith.index_cast %384 : i32 to index
    %c0_116 = arith.constant 0 : index
    %c0_117 = arith.constant 0 : index
    %386 = vector.load %arg10[%385, %c0_116, %c0_117] : memref<8x4x32xf32, #tpu.memory_space<vmem>>, vector<1x4x32xf32>
    %387 = vector.shape_cast %386 : vector<1x4x32xf32> to vector<4x32xf32>
    %388 = vector.shape_cast %383 : vector<4x32xf32> to vector<1x4x32xf32>
    tpu.vector_store %arg10[%385, %c0_116, %c0_117], %388 {strides = array<i32>} : memref<8x4x32xf32, #tpu.memory_space<vmem>>, vector<1x4x32xf32>,
    %c8_i32 = arith.constant 8 : i32
    %c0_118 = arith.constant 0 : index
    %c0_119 = arith.constant 0 : index
    %389 = vector.load %arg7[%c0_118, %c0_119] : memref<4x64xf32, #tpu.memory_space<vmem>>, vector<4x64xf32>
    tpu.vector_store %arg7[%c0_118, %c0_119], %377 {strides = array<i32>} : memref<4x64xf32, #tpu.memory_space<vmem>>, vector<4x64xf32>,
    %c0_120 = arith.constant 0 : index
    %c0_121 = arith.constant 0 : index
    %390 = vector.load %arg8[%c0_120, %c0_121] : memref<4x64xf32, #tpu.memory_space<vmem>>, vector<4x64xf32>
    tpu.vector_store %arg8[%c0_120, %c0_121], %375 {strides = array<i32>} : memref<4x64xf32, #tpu.memory_space<vmem>>, vector<4x64xf32>,
    %c0_122 = arith.constant 0 : index
    %c0_123 = arith.constant 0 : index
    %391 = vector.load %arg3[%c0_122, %c0_123] : memref<32x16xf32, #tpu.memory_space<vmem>>, vector<32x16xf32>
    %c0_124 = arith.constant 0 : index
    %c0_125 = arith.constant 0 : index
    %392 = vector.load %arg4[%c0_124, %c0_125] : memref<32x16xf32, #tpu.memory_space<vmem>>, vector<32x16xf32>
    %c0_126 = arith.constant 0 : index
    %c0_127 = arith.constant 0 : index
    %393 = vector.load %arg5[%c0_126, %c0_127] : memref<1x16xf32, #tpu.memory_space<vmem>>, vector<1x16xf32>
    %c0_i32_128 = arith.constant 0 : i32
    %394 = arith.index_cast %c0_i32_128 : i32 to index
    %c0_129 = arith.constant 0 : index
    %c0_130 = arith.constant 0 : index
    %395 = vector.load %arg9[%394, %c0_129, %c0_130] : memref<8x4x32xf32, #tpu.memory_space<vmem>>, vector<1x4x32xf32>
    %396 = vector.shape_cast %395 : vector<1x4x32xf32> to vector<4x32xf32>
    %cst_131 = arith.constant dense<0.000000e+00> : vector<4x16xf32>
    %397 = tpu.matmul %396, %391, %cst_131 {dimension_numbers = #tpu.dot_dimension_numbers<[1], [0], [0], [1], [0, 0, 1, 1], [], []>} : vector<4x32xf32>, vector<32x16xf32>, vector<4x16xf32> -> vector<4x16xf32>
    %398 = arith.index_cast %c0_i32_128 : i32 to index
    %c0_132 = arith.constant 0 : index
    %c0_133 = arith.constant 0 : index
    %399 = vector.load %arg10[%398, %c0_132, %c0_133] : memref<8x4x32xf32, #tpu.memory_space<vmem>>, vector<1x4x32xf32>
    %400 = vector.shape_cast %399 : vector<1x4x32xf32> to vector<4x32xf32>
    %cst_134 = arith.constant dense<0.000000e+00> : vector<4x16xf32>
    %401 = tpu.matmul %400, %392, %cst_134 {dimension_numbers = #tpu.dot_dimension_numbers<[1], [0], [0], [1], [0, 0, 1, 1], [], []>} : vector<4x32xf32>, vector<32x16xf32>, vector<4x16xf32> -> vector<4x16xf32>
    %402 = arith.addf %397, %401 : vector<4x16xf32>
    %403 = vector.broadcast %393 : vector<1x16xf32> to vector<4x16xf32>
    %404 = arith.addf %402, %403 : vector<4x16xf32>
    %405 = arith.index_cast %c0_i32_128 : i32 to index
    %c0_135 = arith.constant 0 : index
    %c0_136 = arith.constant 0 : index
    %406 = vector.load %arg6[%405, %c0_135, %c0_136] : memref<8x4x16xf32, #tpu.memory_space<vmem>>, vector<1x4x16xf32>
    %407 = vector.shape_cast %406 : vector<1x4x16xf32> to vector<4x16xf32>
    %408 = vector.shape_cast %404 : vector<4x16xf32> to vector<1x4x16xf32>
    tpu.vector_store %arg6[%405, %c0_135, %c0_136], %408 {strides = array<i32>} : memref<8x4x16xf32, #tpu.memory_space<vmem>>, vector<1x4x16xf32>,
    %c1_i32_137 = arith.constant 1 : i32
    %409 = arith.index_cast %c1_i32_137 : i32 to index
    %c0_138 = arith.constant 0 : index
    %c0_139 = arith.constant 0 : index
    %410 = vector.load %arg9[%409, %c0_138, %c0_139] : memref<8x4x32xf32, #tpu.memory_space<vmem>>, vector<1x4x32xf32>
    %411 = vector.shape_cast %410 : vector<1x4x32xf32> to vector<4x32xf32>
    %cst_140 = arith.constant dense<0.000000e+00> : vector<4x16xf32>
    %412 = tpu.matmul %411, %391, %cst_140 {dimension_numbers = #tpu.dot_dimension_numbers<[1], [0], [0], [1], [0, 0, 1, 1], [], []>} : vector<4x32xf32>, vector<32x16xf32>, vector<4x16xf32> -> vector<4x16xf32>
    %413 = arith.index_cast %c1_i32_137 : i32 to index
    %c0_141 = arith.constant 0 : index
    %c0_142 = arith.constant 0 : index
    %414 = vector.load %arg10[%413, %c0_141, %c0_142] : memref<8x4x32xf32, #tpu.memory_space<vmem>>, vector<1x4x32xf32>
    %415 = vector.shape_cast %414 : vector<1x4x32xf32> to vector<4x32xf32>
    %cst_143 = arith.constant dense<0.000000e+00> : vector<4x16xf32>
    %416 = tpu.matmul %415, %392, %cst_143 {dimension_numbers = #tpu.dot_dimension_numbers<[1], [0], [0], [1], [0, 0, 1, 1], [], []>} : vector<4x32xf32>, vector<32x16xf32>, vector<4x16xf32> -> vector<4x16xf32>
    %417 = arith.addf %412, %416 : vector<4x16xf32>
    %418 = vector.broadcast %393 : vector<1x16xf32> to vector<4x16xf32>
    %419 = arith.addf %417, %418 : vector<4x16xf32>
    %420 = arith.index_cast %c1_i32_137 : i32 to index
    %c0_144 = arith.constant 0 : index
    %c0_145 = arith.constant 0 : index
    %421 = vector.load %arg6[%420, %c0_144, %c0_145] : memref<8x4x16xf32, #tpu.memory_space<vmem>>, vector<1x4x16xf32>
    %422 = vector.shape_cast %421 : vector<1x4x16xf32> to vector<4x16xf32>
    %423 = vector.shape_cast %419 : vector<4x16xf32> to vector<1x4x16xf32>
    tpu.vector_store %arg6[%420, %c0_144, %c0_145], %423 {strides = array<i32>} : memref<8x4x16xf32, #tpu.memory_space<vmem>>, vector<1x4x16xf32>,
    %c2_i32_146 = arith.constant 2 : i32
    %424 = arith.index_cast %c2_i32_146 : i32 to index
    %c0_147 = arith.constant 0 : index
    %c0_148 = arith.constant 0 : index
    %425 = vector.load %arg9[%424, %c0_147, %c0_148] : memref<8x4x32xf32, #tpu.memory_space<vmem>>, vector<1x4x32xf32>
    %426 = vector.shape_cast %425 : vector<1x4x32xf32> to vector<4x32xf32>
    %cst_149 = arith.constant dense<0.000000e+00> : vector<4x16xf32>
    %427 = tpu.matmul %426, %391, %cst_149 {dimension_numbers = #tpu.dot_dimension_numbers<[1], [0], [0], [1], [0, 0, 1, 1], [], []>} : vector<4x32xf32>, vector<32x16xf32>, vector<4x16xf32> -> vector<4x16xf32>
    %428 = arith.index_cast %c2_i32_146 : i32 to index
    %c0_150 = arith.constant 0 : index
    %c0_151 = arith.constant 0 : index
    %429 = vector.load %arg10[%428, %c0_150, %c0_151] : memref<8x4x32xf32, #tpu.memory_space<vmem>>, vector<1x4x32xf32>
    %430 = vector.shape_cast %429 : vector<1x4x32xf32> to vector<4x32xf32>
    %cst_152 = arith.constant dense<0.000000e+00> : vector<4x16xf32>
    %431 = tpu.matmul %430, %392, %cst_152 {dimension_numbers = #tpu.dot_dimension_numbers<[1], [0], [0], [1], [0, 0, 1, 1], [], []>} : vector<4x32xf32>, vector<32x16xf32>, vector<4x16xf32> -> vector<4x16xf32>
    %432 = arith.addf %427, %431 : vector<4x16xf32>
    %433 = vector.broadcast %393 : vector<1x16xf32> to vector<4x16xf32>
    %434 = arith.addf %432, %433 : vector<4x16xf32>
    %435 = arith.index_cast %c2_i32_146 : i32 to index
    %c0_153 = arith.constant 0 : index
    %c0_154 = arith.constant 0 : index
    %436 = vector.load %arg6[%435, %c0_153, %c0_154] : memref<8x4x16xf32, #tpu.memory_space<vmem>>, vector<1x4x16xf32>
    %437 = vector.shape_cast %436 : vector<1x4x16xf32> to vector<4x16xf32>
    %438 = vector.shape_cast %434 : vector<4x16xf32> to vector<1x4x16xf32>
    tpu.vector_store %arg6[%435, %c0_153, %c0_154], %438 {strides = array<i32>} : memref<8x4x16xf32, #tpu.memory_space<vmem>>, vector<1x4x16xf32>,
    %c3_i32_155 = arith.constant 3 : i32
    %439 = arith.index_cast %c3_i32_155 : i32 to index
    %c0_156 = arith.constant 0 : index
    %c0_157 = arith.constant 0 : index
    %440 = vector.load %arg9[%439, %c0_156, %c0_157] : memref<8x4x32xf32, #tpu.memory_space<vmem>>, vector<1x4x32xf32>
    %441 = vector.shape_cast %440 : vector<1x4x32xf32> to vector<4x32xf32>
    %cst_158 = arith.constant dense<0.000000e+00> : vector<4x16xf32>
    %442 = tpu.matmul %441, %391, %cst_158 {dimension_numbers = #tpu.dot_dimension_numbers<[1], [0], [0], [1], [0, 0, 1, 1], [], []>} : vector<4x32xf32>, vector<32x16xf32>, vector<4x16xf32> -> vector<4x16xf32>
    %443 = arith.index_cast %c3_i32_155 : i32 to index
    %c0_159 = arith.constant 0 : index
    %c0_160 = arith.constant 0 : index
    %444 = vector.load %arg10[%443, %c0_159, %c0_160] : memref<8x4x32xf32, #tpu.memory_space<vmem>>, vector<1x4x32xf32>
    %445 = vector.shape_cast %444 : vector<1x4x32xf32> to vector<4x32xf32>
    %cst_161 = arith.constant dense<0.000000e+00> : vector<4x16xf32>
    %446 = tpu.matmul %445, %392, %cst_161 {dimension_numbers = #tpu.dot_dimension_numbers<[1], [0], [0], [1], [0, 0, 1, 1], [], []>} : vector<4x32xf32>, vector<32x16xf32>, vector<4x16xf32> -> vector<4x16xf32>
    %447 = arith.addf %442, %446 : vector<4x16xf32>
    %448 = vector.broadcast %393 : vector<1x16xf32> to vector<4x16xf32>
    %449 = arith.addf %447, %448 : vector<4x16xf32>
    %450 = arith.index_cast %c3_i32_155 : i32 to index
    %c0_162 = arith.constant 0 : index
    %c0_163 = arith.constant 0 : index
    %451 = vector.load %arg6[%450, %c0_162, %c0_163] : memref<8x4x16xf32, #tpu.memory_space<vmem>>, vector<1x4x16xf32>
    %452 = vector.shape_cast %451 : vector<1x4x16xf32> to vector<4x16xf32>
    %453 = vector.shape_cast %449 : vector<4x16xf32> to vector<1x4x16xf32>
    tpu.vector_store %arg6[%450, %c0_162, %c0_163], %453 {strides = array<i32>} : memref<8x4x16xf32, #tpu.memory_space<vmem>>, vector<1x4x16xf32>,
    %c4_i32_164 = arith.constant 4 : i32
    %454 = arith.index_cast %c4_i32_164 : i32 to index
    %c0_165 = arith.constant 0 : index
    %c0_166 = arith.constant 0 : index
    %455 = vector.load %arg9[%454, %c0_165, %c0_166] : memref<8x4x32xf32, #tpu.memory_space<vmem>>, vector<1x4x32xf32>
    %456 = vector.shape_cast %455 : vector<1x4x32xf32> to vector<4x32xf32>
    %cst_167 = arith.constant dense<0.000000e+00> : vector<4x16xf32>
    %457 = tpu.matmul %456, %391, %cst_167 {dimension_numbers = #tpu.dot_dimension_numbers<[1], [0], [0], [1], [0, 0, 1, 1], [], []>} : vector<4x32xf32>, vector<32x16xf32>, vector<4x16xf32> -> vector<4x16xf32>
    %458 = arith.index_cast %c4_i32_164 : i32 to index
    %c0_168 = arith.constant 0 : index
    %c0_169 = arith.constant 0 : index
    %459 = vector.load %arg10[%458, %c0_168, %c0_169] : memref<8x4x32xf32, #tpu.memory_space<vmem>>, vector<1x4x32xf32>
    %460 = vector.shape_cast %459 : vector<1x4x32xf32> to vector<4x32xf32>
    %cst_170 = arith.constant dense<0.000000e+00> : vector<4x16xf32>
    %461 = tpu.matmul %460, %392, %cst_170 {dimension_numbers = #tpu.dot_dimension_numbers<[1], [0], [0], [1], [0, 0, 1, 1], [], []>} : vector<4x32xf32>, vector<32x16xf32>, vector<4x16xf32> -> vector<4x16xf32>
    %462 = arith.addf %457, %461 : vector<4x16xf32>
    %463 = vector.broadcast %393 : vector<1x16xf32> to vector<4x16xf32>
    %464 = arith.addf %462, %463 : vector<4x16xf32>
    %465 = arith.index_cast %c4_i32_164 : i32 to index
    %c0_171 = arith.constant 0 : index
    %c0_172 = arith.constant 0 : index
    %466 = vector.load %arg6[%465, %c0_171, %c0_172] : memref<8x4x16xf32, #tpu.memory_space<vmem>>, vector<1x4x16xf32>
    %467 = vector.shape_cast %466 : vector<1x4x16xf32> to vector<4x16xf32>
    %468 = vector.shape_cast %464 : vector<4x16xf32> to vector<1x4x16xf32>
    tpu.vector_store %arg6[%465, %c0_171, %c0_172], %468 {strides = array<i32>} : memref<8x4x16xf32, #tpu.memory_space<vmem>>, vector<1x4x16xf32>,
    %c5_i32_173 = arith.constant 5 : i32
    %469 = arith.index_cast %c5_i32_173 : i32 to index
    %c0_174 = arith.constant 0 : index
    %c0_175 = arith.constant 0 : index
    %470 = vector.load %arg9[%469, %c0_174, %c0_175] : memref<8x4x32xf32, #tpu.memory_space<vmem>>, vector<1x4x32xf32>
    %471 = vector.shape_cast %470 : vector<1x4x32xf32> to vector<4x32xf32>
    %cst_176 = arith.constant dense<0.000000e+00> : vector<4x16xf32>
    %472 = tpu.matmul %471, %391, %cst_176 {dimension_numbers = #tpu.dot_dimension_numbers<[1], [0], [0], [1], [0, 0, 1, 1], [], []>} : vector<4x32xf32>, vector<32x16xf32>, vector<4x16xf32> -> vector<4x16xf32>
    %473 = arith.index_cast %c5_i32_173 : i32 to index
    %c0_177 = arith.constant 0 : index
    %c0_178 = arith.constant 0 : index
    %474 = vector.load %arg10[%473, %c0_177, %c0_178] : memref<8x4x32xf32, #tpu.memory_space<vmem>>, vector<1x4x32xf32>
    %475 = vector.shape_cast %474 : vector<1x4x32xf32> to vector<4x32xf32>
    %cst_179 = arith.constant dense<0.000000e+00> : vector<4x16xf32>
    %476 = tpu.matmul %475, %392, %cst_179 {dimension_numbers = #tpu.dot_dimension_numbers<[1], [0], [0], [1], [0, 0, 1, 1], [], []>} : vector<4x32xf32>, vector<32x16xf32>, vector<4x16xf32> -> vector<4x16xf32>
    %477 = arith.addf %472, %476 : vector<4x16xf32>
    %478 = vector.broadcast %393 : vector<1x16xf32> to vector<4x16xf32>
    %479 = arith.addf %477, %478 : vector<4x16xf32>
    %480 = arith.index_cast %c5_i32_173 : i32 to index
    %c0_180 = arith.constant 0 : index
    %c0_181 = arith.constant 0 : index
    %481 = vector.load %arg6[%480, %c0_180, %c0_181] : memref<8x4x16xf32, #tpu.memory_space<vmem>>, vector<1x4x16xf32>
    %482 = vector.shape_cast %481 : vector<1x4x16xf32> to vector<4x16xf32>
    %483 = vector.shape_cast %479 : vector<4x16xf32> to vector<1x4x16xf32>
    tpu.vector_store %arg6[%480, %c0_180, %c0_181], %483 {strides = array<i32>} : memref<8x4x16xf32, #tpu.memory_space<vmem>>, vector<1x4x16xf32>,
    %c6_i32_182 = arith.constant 6 : i32
    %484 = arith.index_cast %c6_i32_182 : i32 to index
    %c0_183 = arith.constant 0 : index
    %c0_184 = arith.constant 0 : index
    %485 = vector.load %arg9[%484, %c0_183, %c0_184] : memref<8x4x32xf32, #tpu.memory_space<vmem>>, vector<1x4x32xf32>
    %486 = vector.shape_cast %485 : vector<1x4x32xf32> to vector<4x32xf32>
    %cst_185 = arith.constant dense<0.000000e+00> : vector<4x16xf32>
    %487 = tpu.matmul %486, %391, %cst_185 {dimension_numbers = #tpu.dot_dimension_numbers<[1], [0], [0], [1], [0, 0, 1, 1], [], []>} : vector<4x32xf32>, vector<32x16xf32>, vector<4x16xf32> -> vector<4x16xf32>
    %488 = arith.index_cast %c6_i32_182 : i32 to index
    %c0_186 = arith.constant 0 : index
    %c0_187 = arith.constant 0 : index
    %489 = vector.load %arg10[%488, %c0_186, %c0_187] : memref<8x4x32xf32, #tpu.memory_space<vmem>>, vector<1x4x32xf32>
    %490 = vector.shape_cast %489 : vector<1x4x32xf32> to vector<4x32xf32>
    %cst_188 = arith.constant dense<0.000000e+00> : vector<4x16xf32>
    %491 = tpu.matmul %490, %392, %cst_188 {dimension_numbers = #tpu.dot_dimension_numbers<[1], [0], [0], [1], [0, 0, 1, 1], [], []>} : vector<4x32xf32>, vector<32x16xf32>, vector<4x16xf32> -> vector<4x16xf32>
    %492 = arith.addf %487, %491 : vector<4x16xf32>
    %493 = vector.broadcast %393 : vector<1x16xf32> to vector<4x16xf32>
    %494 = arith.addf %492, %493 : vector<4x16xf32>
    %495 = arith.index_cast %c6_i32_182 : i32 to index
    %c0_189 = arith.constant 0 : index
    %c0_190 = arith.constant 0 : index
    %496 = vector.load %arg6[%495, %c0_189, %c0_190] : memref<8x4x16xf32, #tpu.memory_space<vmem>>, vector<1x4x16xf32>
    %497 = vector.shape_cast %496 : vector<1x4x16xf32> to vector<4x16xf32>
    %498 = vector.shape_cast %494 : vector<4x16xf32> to vector<1x4x16xf32>
    tpu.vector_store %arg6[%495, %c0_189, %c0_190], %498 {strides = array<i32>} : memref<8x4x16xf32, #tpu.memory_space<vmem>>, vector<1x4x16xf32>,
    %c7_i32_191 = arith.constant 7 : i32
    %499 = arith.index_cast %c7_i32_191 : i32 to index
    %c0_192 = arith.constant 0 : index
    %c0_193 = arith.constant 0 : index
    %500 = vector.load %arg9[%499, %c0_192, %c0_193] : memref<8x4x32xf32, #tpu.memory_space<vmem>>, vector<1x4x32xf32>
    %501 = vector.shape_cast %500 : vector<1x4x32xf32> to vector<4x32xf32>
    %cst_194 = arith.constant dense<0.000000e+00> : vector<4x16xf32>
    %502 = tpu.matmul %501, %391, %cst_194 {dimension_numbers = #tpu.dot_dimension_numbers<[1], [0], [0], [1], [0, 0, 1, 1], [], []>} : vector<4x32xf32>, vector<32x16xf32>, vector<4x16xf32> -> vector<4x16xf32>
    %503 = arith.index_cast %c7_i32_191 : i32 to index
    %c0_195 = arith.constant 0 : index
    %c0_196 = arith.constant 0 : index
    %504 = vector.load %arg10[%503, %c0_195, %c0_196] : memref<8x4x32xf32, #tpu.memory_space<vmem>>, vector<1x4x32xf32>
    %505 = vector.shape_cast %504 : vector<1x4x32xf32> to vector<4x32xf32>
    %cst_197 = arith.constant dense<0.000000e+00> : vector<4x16xf32>
    %506 = tpu.matmul %505, %392, %cst_197 {dimension_numbers = #tpu.dot_dimension_numbers<[1], [0], [0], [1], [0, 0, 1, 1], [], []>} : vector<4x32xf32>, vector<32x16xf32>, vector<4x16xf32> -> vector<4x16xf32>
    %507 = arith.addf %502, %506 : vector<4x16xf32>
    %508 = vector.broadcast %393 : vector<1x16xf32> to vector<4x16xf32>
    %509 = arith.addf %507, %508 : vector<4x16xf32>
    %510 = arith.index_cast %c7_i32_191 : i32 to index
    %c0_198 = arith.constant 0 : index
    %c0_199 = arith.constant 0 : index
    %511 = vector.load %arg6[%510, %c0_198, %c0_199] : memref<8x4x16xf32, #tpu.memory_space<vmem>>, vector<1x4x16xf32>
    %512 = vector.shape_cast %511 : vector<1x4x16xf32> to vector<4x16xf32>
    %513 = vector.shape_cast %509 : vector<4x16xf32> to vector<1x4x16xf32>
    tpu.vector_store %arg6[%510, %c0_198, %c0_199], %513 {strides = array<i32>} : memref<8x4x16xf32, #tpu.memory_space<vmem>>, vector<1x4x16xf32>,
    %c8_i32_200 = arith.constant 8 : i32
    return
  }
  func.func @transform_0(%arg0: i32) -> (i32, i32, i32) {
    %c0_i32 = arith.constant 0 : i32
    %c0_i32_0 = arith.constant 0 : i32
    %c0_i32_1 = arith.constant 0 : i32
    %c0_i32_2 = arith.constant 0 : i32
    return %c0_i32, %c0_i32_0, %c0_i32_1 : i32, i32, i32
  }
  func.func @transform_1(%arg0: i32) -> (i32, i32) {
    %c0_i32 = arith.constant 0 : i32
    %c0_i32_0 = arith.constant 0 : i32
    %c0_i32_1 = arith.constant 0 : i32
    return %c0_i32, %c0_i32_0 : i32, i32
  }
  func.func @transform_2(%arg0: i32) -> (i32, i32) {
    %c0_i32 = arith.constant 0 : i32
    %c0_i32_0 = arith.constant 0 : i32
    %c0_i32_1 = arith.constant 0 : i32
    return %c0_i32, %c0_i32_0 : i32, i32
  }
  func.func @transform_3(%arg0: i32) -> (i32, i32) {
    %c0_i32 = arith.constant 0 : i32
    %c0_i32_0 = arith.constant 0 : i32
    %c0_i32_1 = arith.constant 0 : i32
    return %c0_i32, %c0_i32_0 : i32, i32
  }
  func.func @transform_4(%arg0: i32) -> (i32, i32) {
    %c0_i32 = arith.constant 0 : i32
    %c0_i32_0 = arith.constant 0 : i32
    %c0_i32_1 = arith.constant 0 : i32
    return %c0_i32, %c0_i32_0 : i32, i32
  }
  func.func @transform_5(%arg0: i32) -> (i32, i32, i32) {
    %c0_i32 = arith.constant 0 : i32
    %c0_i32_0 = arith.constant 0 : i32
    %c0_i32_1 = arith.constant 0 : i32
    %c0_i32_2 = arith.constant 0 : i32
    return %c0_i32, %c0_i32_0, %c0_i32_1 : i32, i32, i32
  }
  func.func @transform_6(%arg0: i32) -> (i32, i32) {
    %c0_i32 = arith.constant 0 : i32
    %c0_i32_0 = arith.constant 0 : i32
    %c0_i32_1 = arith.constant 0 : i32
    return %c0_i32, %c0_i32_0 : i32, i32
  }
  func.func @transform_7(%arg0: i32) -> (i32, i32) {
    %c0_i32 = arith.constant 0 : i32
    %c0_i32_0 = arith.constant 0 : i32
    %c0_i32_1 = arith.constant 0 : i32
    return %c0_i32, %c0_i32_0 : i32, i32
  }
}

</mosaic_0001>

<bundles_post_ra>
// kernel: pos_tagger_forward.1
= control target key start
LH: loop header
LB: loop body
LE: loop exit
PB: predicated region body
PF: predicated region fallthrough
CT: control target
= control target key end

     0   :  { %s2281_s0 = inlined_call_operand.vmem [shape: f32[8,4,256], index: 0, kind: input, shape index: {}]   ;;  %s2282_s1 = inlined_call_operand.vmem [shape: f32[64,256], index: 1, kind: input, shape index: {}]   ;;  %s2283_s2 = inlined_call_operand.vmem [shape: f32[32,16], index: 2, kind: input, shape index: {}]   ;;  %s2284_s3 = inlined_call_operand.vmem [shape: f32[32,16], index: 3, kind: input, shape index: {}]   ;;  %s2285_s4 = inlined_call_operand.vmem [shape: f32[1,16], index: 4, kind: input, shape index: {}]   ;;  %s2286_s5 = inlined_call_operand.hbm [shape: f32[8,4,16], index: 5, kind: output, shape index: {0}]   ;;  %s2287_s6 = inlined_call_operand.vmem [shape: f32[4,64], index: 6, kind: output, shape index: {1}]   ;;  %s2288_s7 = inlined_call_operand.vmem [shape: f32[4,64], index: 7, kind: output, shape index: {2}]  }
   0x1   :  { %v1719_v0 = vld [vmem:[%s2282_s1 + $0x70] sm:$0xff]  ;;  %v1724_v1 = vld [vmem:[%s2282_s1 + $0x60] sm:$0xff]  ;;  %v1730_v2 = vld [vmem:[%s2282_s1 + $0x78] sm:$0xff] }
   0x2   :  { %98 = vmatpush.msra.mxu0 %v1719_v0  ;;  %219 = vmatpush.msra.mxu2 %v1719_v0  ;;  %v1736_v3 = vld [vmem:[%s2282_s1 + $0x50] sm:$0xff]  ;;  %v1742_v4 = vld [vmem:[%s2282_s1 + $0x68] sm:$0xff]  ;;  %v1749_v5 = vld [vmem:[%s2282_s1 + $0x58] sm:$0xff] }
   0x3   :  { %118 = vmatpush.msra.mxu1 %v1730_v2  ;;  %239 = vmatpush.msra.mxu3 %v1730_v2  ;;  %v1755_v6 = vld [vmem:[%s2282_s1 + $0x40] sm:$0xff]  ;;  %v1763_v7 = vld [vmem:[%s2282_s1 + $0x48] sm:$0xff]  ;;  %v1772_v9 = vld [vmem:[%s2282_s1 + $0x30] sm:$0xff] }
   0x4   :  { %99 = vmatpush.msra.mxu0 %v1724_v1  ;;  %220 = vmatpush.msra.mxu2 %v1724_v1  ;;  %v69_v8 = vld [vmem:[%s2281_s0] sm:$0xff]  ;;  %v1780_v10 = vld [vmem:[%s2282_s1 + $0x38] sm:$0xff] }
   0x5   :  { %119 = vmatpush.msra.mxu1 %v1742_v4  ;;  %240 = vmatpush.msra.mxu3 %v1742_v4  ;;  %73 = vst [vmem:[#allocation1] ss:$2 sm:$0xff] %v69_v8 }
   0x6   :  { %100 = vmatpush.msra.mxu0 %v1736_v3  ;;  %221 = vmatpush.msra.mxu2 %v1736_v3 }
   0x7   :  { %120 = vmatpush.msra.mxu1 %v1749_v5  ;;  %241 = vmatpush.msra.mxu3 %v1749_v5 }
   0x8   :  { %101 = vmatpush.msra.mxu0 %v1755_v6  ;;  %222 = vmatpush.msra.mxu2 %v1755_v6 }
   0x9   :  { %13 = vsyncpa [#allocation5], 0  ;;  %v1786_v11 = vld [vmem:[%s2282_s1 + $0x20] sm:$0xff]  ;;  %121 = vmatpush.msra.mxu1 %v1763_v7  ;;  %242 = vmatpush.msra.mxu3 %v1763_v7  ;;  %v1794_v12 = vld [vmem:[%s2282_s1 + $0x28] sm:$0xff]  ;;  %v1671_v20 = vmov 0.0   ;;  %v40_v21 = vlaneseq  ;;  %vm184_vm10 = vcmask 257024  }
   0xa   :  { %102 = vmatpush.msra.mxu0 %v1772_v9  ;;  %223 = vmatpush.msra.mxu2 %v1772_v9  ;;  %v1800_v13 = vld [vmem:[%s2282_s1 + $0x10] sm:$0xff]  ;;  %v1808_v14 = vld [vmem:[%s2282_s1 + $0x18] sm:$0xff]  ;;  %v1817_v16 = vld [vmem:[%s2282_s1] sm:$0xff]  ;;  %vm86_vm11 = vcmask 523264   ;;  %s1463_s28 = sshll.u32 %s2286_s5, 4  ;;  %s1675_s29 = smov 4   ;;  %s1464_s28 = int_to_ptr.hbm [resolvable:$true] %s1463_s28 }
   0xb   :  { %122 = vmatpush.msra.mxu1 %v1780_v10  ;;  %243 = vmatpush.msra.mxu3 %v1780_v10  ;;  %v1483_v15 = vld [vmem:[%s2281_s0 + $0x38] sm:$0xff]  ;;  %v1823_v17 = vld [vmem:[%s2282_s1 + $0x8] sm:$0xff]  ;;  %v41_v22 = vand.u32 127, %v40_v21  ;;  %s1672_s1 = smov 64  }
   0xc   :  { %103 = vmatpush.msra.mxu0 %v1786_v11  ;;  %224 = vmatpush.msra.mxu2 %v1786_v11  ;;  %v1827_v18 = vld.sshfl [vmem:[#allocation1] sm:$0xff pattern:$0x75316420]  ;;  %v1829_v19 = vld.sshfl [vmem:[#allocation1 + $0x8] sm:$0xff pattern:$0x75316420] }
   0xd   :  { %123 = vmatpush.msra.mxu1 %v1794_v12  ;;  %244 = vmatpush.msra.mxu3 %v1794_v12  ;;  %79 = vst [vmem:[#allocation1] ss:$2 sm:$0xff] %v1483_v15  ;;  %v47_v23 = vand.u32 63, %v41_v22  ;;  %v42_v30 = vadd.s32 128, %v41_v22  ;;  %v1911_v21 = vld [vmem:[%s2281_s0 + $0x8] sm:$0xff]  ;;  %v1917_v22 = vld [vmem:[%s2281_s0 + $0x30] sm:$0xff] }
   0xe   :  { %104 = vmatpush.msra.mxu0 %v1800_v13  ;;  %225 = vmatpush.msra.mxu2 %v1800_v13 }
   0xf   :  { %124 = vmatpush.msra.mxu1 %v1808_v14  ;;  %245 = vmatpush.msra.mxu3 %v1808_v14  ;;  %vm1886_vm0 = vcmp.lt.s32.totalorder %v47_v23, 32  ;;  %v54_v31 = vand.u32 63, %v42_v30 }
  0x10   :  { %105 = vmatpush.msra.mxu0 %v1817_v16  ;;  %226 = vmatpush.msra.mxu2 %v1817_v16 }
  0x11   :  { %106 = vmatmul.f32.vlgmr.msra.gmra.mxu0 %v1671_v20  ;;  %125 = vmatpush.msra.mxu1 %v1823_v17  ;;  %vm1893_vm1 = vcmp.lt.s32.totalorder %v54_v31, 32 }
  0x12   :  { %126 = vmatmul.f32.vlgmr.msra.gmra.mxu1 %v1671_v20  ;;  %246 = vmatpush.msra.mxu3 %v1823_v17 }
  0x13   :  { %340 = vmatpush.msrb.mxu0 %v1719_v0  ;;  %360 = vmatpush.msrb.mxu1 %v1730_v2 }
  0x14   :  { %461 = vmatpush.msrb.mxu2 %v1719_v0  ;;  %481 = vmatpush.msrb.mxu3 %v1730_v2  ;;  %v80_v25 = vld.sshfl [vmem:[#allocation1] sm:$0xff pattern:$0x75316420]  ;;  %v81_v35 = vld.sshfl [vmem:[#allocation1 + $0x8] sm:$0xff pattern:$0x75316420] }
  0x15   :  { %341 = vmatpush.msrb.mxu0 %v1724_v1  ;;  %361 = vmatpush.msrb.mxu1 %v1742_v4  ;;  %v84_v26 = vsel %vm1886_vm0, %v1827_v18, %v80_v25  ;;  %v85_v36 = vsel %vm1893_vm1, %v1829_v19, %v81_v35  ;;  %196 = vst [vmem:[#allocation1] ss:$2 sm:$0xff] %v1911_v21 }
  0x16   :  { %462 = vmatpush.msrb.mxu2 %v1724_v1  ;;  %482 = vmatpush.msrb.mxu3 %v1742_v4 }
  0x17   :  { %342 = vmatpush.msrb.mxu0 %v1736_v3  ;;  %362 = vmatpush.msrb.mxu1 %v1749_v5 }
  0x18   :  { %463 = vmatpush.msrb.mxu2 %v1736_v3  ;;  %483 = vmatpush.msrb.mxu3 %v1749_v5 }
  0x19   :  { %343 = vmatpush.msrb.mxu0 %v1755_v6  ;;  %363 = vmatpush.msrb.mxu1 %v1763_v7 }
  0x1a   :  { %464 = vmatpush.msrb.mxu2 %v1755_v6  ;;  %484 = vmatpush.msrb.mxu3 %v1763_v7 }
  0x1b   :  { %344 = vmatpush.msrb.mxu0 %v1772_v9  ;;  %364 = vmatpush.msrb.mxu1 %v1780_v10 }
  0x1c   :  { %465 = vmatpush.msrb.mxu2 %v1772_v9  ;;  %485 = vmatpush.msrb.mxu3 %v1780_v10  ;;  %v197_v23 = vld.sshfl [vmem:[#allocation1] sm:$0xff pattern:$0x75316420]  ;;  %v198_v25 = vld.sshfl [vmem:[#allocation1 + $0x8] sm:$0xff pattern:$0x75316420] }
  0x1d   :  { %345 = vmatpush.msrb.mxu0 %v1786_v11  ;;  %365 = vmatpush.msrb.mxu1 %v1794_v12  ;;  %202 = vst [vmem:[#allocation1] ss:$2 sm:$0xff] %v1917_v22 }
  0x1e   :  { %466 = vmatpush.msrb.mxu2 %v1786_v11  ;;  %486 = vmatpush.msrb.mxu3 %v1794_v12 }
  0x1f   :  { %346 = vmatpush.msrb.mxu0 %v1800_v13  ;;  %366 = vmatpush.msrb.mxu1 %v1808_v14 }
  0x20   :  { %467 = vmatpush.msrb.mxu2 %v1800_v13  ;;  %487 = vmatpush.msrb.mxu3 %v1808_v14 }
  0x21   :  { %347 = vmatpush.msrb.mxu0 %v1817_v16  ;;  %367 = vmatpush.msrb.mxu1 %v1823_v17 }
  0x22   :  { %468 = vmatpush.msrb.mxu2 %v1817_v16  ;;  %488 = vmatpush.msrb.mxu3 %v1823_v17 }
  0x23   :  { %580 = vmatpush.msra.mxu0 %v1719_v0  ;;  %600 = vmatpush.msra.mxu1 %v1730_v2 }
  0x24   :  { %v204_v35 = vld.sshfl [vmem:[#allocation1 + $0x8] sm:$0xff pattern:$0x75316420] }
  0x25   :  { %581 = vmatpush.msra.mxu0 %v1724_v1  ;;  %601 = vmatpush.msra.mxu1 %v1742_v4 }
  0x27   :  { %582 = vmatpush.msra.mxu0 %v1736_v3  ;;  %602 = vmatpush.msra.mxu1 %v1749_v5 }
  0x29   :  { %583 = vmatpush.msra.mxu0 %v1755_v6  ;;  %603 = vmatpush.msra.mxu1 %v1763_v7 }
  0x2b   :  { %584 = vmatpush.msra.mxu0 %v1772_v9  ;;  %604 = vmatpush.msra.mxu1 %v1780_v10 }
  0x2d   :  { %585 = vmatpush.msra.mxu0 %v1786_v11  ;;  %605 = vmatpush.msra.mxu1 %v1794_v12 }
  0x2f   :  { %586 = vmatpush.msra.mxu0 %v1800_v13  ;;  %606 = vmatpush.msra.mxu1 %v1808_v14 }
  0x31   :  { %587 = vmatpush.msra.mxu0 %v1817_v16  ;;  %607 = vmatpush.msra.mxu1 %v1823_v17 }
  0x8e   :  { %v107_v27 = vpop.f32.mrf.mxu0 }
  0x8f   :  { %v130_v28 = vadd.f32 %v107_v27, %v84_v26  ;;  %v127_v37 = vpop.f32.mrf.mxu1  ;;  %v203_v27 = vld.sshfl [vmem:[#allocation1] sm:$0xff pattern:$0x75316420] }
  0x90   :  { %v131_v39 = vadd.f32 %v127_v37, %v85_v36  ;;  %v208_v36 = vsel %vm1893_vm1, %v198_v25, %v204_v35 }
  0x91   :  { %v1484_v29 = vmul.f32 -1.442695, %v130_v28  ;;  %v207_v28 = vsel %vm1886_vm0, %v197_v23, %v203_v27 }
  0x92   :  { %v1485_v51 = vmul.f32 -1.442695, %v131_v39 }
  0x93   :  { %1549 = vpow2.f32 %v1484_v29 }
  0x99   :  { %v1550_v32 = vpop.eup %1549 }
  0x9a   :  { %v135_v33 = vadd.f32 1.0, %v1550_v32 }
  0x9c   :  { %1551 = vrcp.f32 %v135_v33  ;;  %v147_v42 = vand.u32 2147483648, %v135_v33  ;;  %v145_v44 = vand.u32 2147483647, %v135_v33  ;;  %vm141_vm3 = vweird.f32 %v135_v33 }
  0x9d   :  { %1553 = vtanh.f32 %v131_v39 }
  0x9e   :  { %v148_v47 = vor.u32 1.1754944e-38, %v147_v42  ;;  %vm146_vm5 = vcmp.eq.f32.partialorder %v145_v44, 8.507059e+37  ;;  %1555 = vpow2.f32 %v1485_v51 }
  0xa2   :  { %v1552_v38 = vpop.eup %1551 }
  0xa3   :  { %v137_v40 = vmul.f32 %v1552_v38, %v135_v33  ;;  %vm142_vm2 = vweird.f32 %v1552_v38  ;;  %v1554_v46 = vpop.eup %1553 }
  0xa4   :  { %vm143_vm4 = vmor %vm141_vm3, %vm142_vm2  ;;  %v1556_v52 = vpop.eup %1555 }
  0xa5   :  { %v138_v41 = vsub.f32 1.0, %v137_v40  ;;  %v155_v53 = vadd.f32 1.0, %v1556_v52 }
  0xa7   :  { %v139_v43 = vmul.f32 %v1552_v38, %v138_v41  ;;  %1557 = vrcp.f32 %v155_v53  ;;  %vm161_vm6 = vweird.f32 %v155_v53  ;;  %v167_v61 = vand.u32 2147483648, %v155_v53 }
  0xa8   :  { %v165_v63 = vand.u32 2147483647, %v155_v53 }
  0xa9   :  { %v140_v45 = vadd.f32 %v1552_v38, %v139_v43  ;;  %v168_v8 = vor.u32 1.1754944e-38, %v167_v61 }
  0xaa   :  { %vm166_vm9 = vcmp.eq.f32.partialorder %v165_v63, 8.507059e+37 }
  0xab   :  { %v144_v48 = vsel %vm143_vm4, %v1552_v38, %v140_v45 }
  0xac   :  { %v149_v49 = vsel %vm146_vm5, %v148_v47, %v144_v48 }
  0xad   :  { %v172_v50 = vmul.f32 %v1554_v46, %v149_v49  ;;  %v1558_v54 = vpop.eup %1557  ;;  %v171_v58 = vmul.f32 0.0, %v149_v49 }
  0xae   :  { %v157_v55 = vmul.f32 %v1558_v54, %v155_v53  ;;  %vm162_vm7 = vweird.f32 %v1558_v54 }
  0xaf   :  { %174 = vrot.lane.b32.xlu0 %v172_v50, %s1672_s1  ;;  %vm163_vm8 = vmor %vm161_vm6, %vm162_vm7 }
  0xb0   :  { %v158_v56 = vsub.f32 1.0, %v157_v55 }
  0xb2   :  { %v159_v57 = vmul.f32 %v1558_v54, %v158_v56 }
  0xb4   :  { %v160_v62 = vadd.f32 %v1558_v54, %v159_v57 }
  0xb6   :  { %v164_v15 = vsel %vm163_vm8, %v1558_v54, %v160_v62 }
  0xb7   :  { %v169_v19 = vsel %vm166_vm9, %v168_v8, %v164_v15 }
 0x121   :  { %v175_v59 = vpop.permute.xlu0 %174 }
 0x122   :  { %v1901_v60 = vadd.f32 %v175_v59, %v171_v58 }
 0x124   :  { %1559 = vtanh.f32 %v1901_v60 }
 0x12a   :  { %v1560_v18 = vpop.eup %1559 }
 0x12b   :  { %v1904_v20 = vmul.f32 %v1560_v18, %v169_v19 }
 0x12d   :  { %181 = vrot.lane.b32.xlu0 %v1904_v20, %s1672_s1 }
 0x19f   :  { %v182_v26 = vpop.permute.xlu0 %181 }
 0x1a0   :  { %185 = vst.msk [vmem:[#allocation2] sm:$0xf] %vm184_vm10, %v182_v26  ;;  %1488 = vmatmul.msk.f32.vlgmr.msra.gmra.mxu2 %vm86_vm11, %v182_v26  ;;  %1489 = vmatmul.msk.f32.vlgmr.msra.gmra.mxu3 %vm86_vm11, %v182_v26  ;;  %v1961_v26 = vld [vmem:[%s2281_s0 + $0x28] sm:$0xff] }
 0x1a1   :  { %699 = vmatpush.msra.mxu2 %v1719_v0  ;;  %719 = vmatpush.msra.mxu3 %v1730_v2 }
 0x1a3   :  { %700 = vmatpush.msra.mxu2 %v1724_v1  ;;  %720 = vmatpush.msra.mxu3 %v1742_v4 }
 0x1a5   :  { %701 = vmatpush.msra.mxu2 %v1736_v3  ;;  %721 = vmatpush.msra.mxu3 %v1749_v5 }
 0x1a7   :  { %702 = vmatpush.msra.mxu2 %v1755_v6  ;;  %722 = vmatpush.msra.mxu3 %v1763_v7 }
 0x1a9   :  { %703 = vmatpush.msra.mxu2 %v1772_v9  ;;  %723 = vmatpush.msra.mxu3 %v1780_v10 }
 0x1ab   :  { %704 = vmatpush.msra.mxu2 %v1786_v11  ;;  %724 = vmatpush.msra.mxu3 %v1794_v12 }
 0x1ad   :  { %705 = vmatpush.msra.mxu2 %v1800_v13  ;;  %725 = vmatpush.msra.mxu3 %v1808_v14 }
 0x1af   :  { %706 = vmatpush.msra.mxu2 %v1817_v16  ;;  %726 = vmatpush.msra.mxu3 %v1823_v17 }
 0x223   :  { %v228_v29 = vpop.f32.mrf.mxu2  ;;  %v248_v37 = vpop.f32.mrf.mxu3 }
 0x224   :  { %v251_v30 = vadd.f32 %v228_v29, %v207_v28  ;;  %v252_v39 = vadd.f32 %v248_v37, %v208_v36 }
 0x226   :  { %v1490_v31 = vmul.f32 -1.442695, %v251_v30  ;;  %v1491_v51 = vmul.f32 -1.442695, %v252_v39 }
 0x228   :  { %1561 = vpow2.f32 %v1490_v31 }
 0x22e   :  { %v1562_v32 = vpop.eup %1561 }
 0x22f   :  { %v256_v33 = vadd.f32 1.0, %v1562_v32 }
 0x231   :  { %1563 = vrcp.f32 %v256_v33  ;;  %v268_v42 = vand.u32 2147483648, %v256_v33  ;;  %v266_v44 = vand.u32 2147483647, %v256_v33  ;;  %vm262_vm13 = vweird.f32 %v256_v33 }
 0x232   :  { %1565 = vtanh.f32 %v252_v39 }
 0x233   :  { %v269_v46 = vor.u32 1.1754944e-38, %v268_v42  ;;  %vm267_vm15 = vcmp.eq.f32.partialorder %v266_v44, 8.507059e+37  ;;  %1567 = vpow2.f32 %v1491_v51 }
 0x237   :  { %v1564_v38 = vpop.eup %1563 }
 0x238   :  { %v258_v40 = vmul.f32 %v1564_v38, %v256_v33  ;;  %vm263_vm12 = vweird.f32 %v1564_v38  ;;  %v1566_v48 = vpop.eup %1565 }
 0x239   :  { %vm264_vm14 = vmor %vm262_vm13, %vm263_vm12  ;;  %v1568_v52 = vpop.eup %1567 }
 0x23a   :  { %v259_v41 = vsub.f32 1.0, %v258_v40  ;;  %v276_v53 = vadd.f32 1.0, %v1568_v52 }
 0x23c   :  { %v260_v43 = vmul.f32 %v1564_v38, %v259_v41  ;;  %1569 = vrcp.f32 %v276_v53  ;;  %v288_v63 = vand.u32 2147483648, %v276_v53  ;;  %vm282_vm3 = vweird.f32 %v276_v53 }
 0x23d   :  { %v286_v8 = vand.u32 2147483647, %v276_v53 }
 0x23e   :  { %v261_v45 = vadd.f32 %v1564_v38, %v260_v43  ;;  %v289_v18 = vor.u32 1.1754944e-38, %v288_v63 }
 0x23f   :  { %vm287_vm5 = vcmp.eq.f32.partialorder %v286_v8, 8.507059e+37 }
 0x240   :  { %v265_v47 = vsel %vm264_vm14, %v1564_v38, %v261_v45 }
 0x241   :  { %v270_v49 = vsel %vm267_vm15, %v269_v46, %v265_v47 }
 0x242   :  { %v293_v50 = vmul.f32 %v1566_v48, %v270_v49  ;;  %v1570_v54 = vpop.eup %1569  ;;  %v292_v58 = vmul.f32 %v270_v49, %v1901_v60  ;;  %v1955_v60 = vld [vmem:[%s2281_s0 + $0x10] sm:$0xff] }
 0x243   :  { %v278_v55 = vmul.f32 %v1570_v54, %v276_v53  ;;  %vm283_vm2 = vweird.f32 %v1570_v54  ;;  %317 = vst [vmem:[#allocation1] ss:$2 sm:$0xff] %v1955_v60 }
 0x244   :  { %295 = vrot.lane.b32.xlu1 %v293_v50, %s1672_s1  ;;  %vm284_vm4 = vmor %vm282_vm3, %vm283_vm2 }
 0x245   :  { %v279_v56 = vsub.f32 1.0, %v278_v55 }
 0x247   :  { %v280_v57 = vmul.f32 %v1570_v54, %v279_v56 }
 0x249   :  { %v281_v62 = vadd.f32 %v1570_v54, %v280_v57 }
 0x24a   :  { %v318_v27 = vld.sshfl [vmem:[#allocation1] sm:$0xff pattern:$0x75316420]  ;;  %v319_v28 = vld.sshfl [vmem:[#allocation1 + $0x8] sm:$0xff pattern:$0x75316420] }
 0x24b   :  { %v285_v15 = vsel %vm284_vm4, %v1570_v54, %v281_v62  ;;  %323 = vst [vmem:[#allocation1] ss:$2 sm:$0xff] %v1961_v26 }
 0x24c   :  { %v290_v23 = vsel %vm287_vm5, %v289_v18, %v285_v15 }
 0x252   :  { %v324_v30 = vld.sshfl [vmem:[#allocation1] sm:$0xff pattern:$0x75316420]  ;;  %v325_v38 = vld.sshfl [vmem:[#allocation1 + $0x8] sm:$0xff pattern:$0x75316420] }
 0x253   :  { %v328_v31 = vsel %vm1886_vm0, %v318_v27, %v324_v30  ;;  %v329_v39 = vsel %vm1893_vm1, %v319_v28, %v325_v38 }
 0x2b6   :  { %v296_v59 = vpop.permute.xlu1 %295 }
 0x2b7   :  { %v1945_v61 = vadd.f32 %v296_v59, %v292_v58 }
 0x2b9   :  { %1571 = vtanh.f32 %v1945_v61 }
 0x2bf   :  { %v1572_v19 = vpop.eup %1571 }
 0x2c0   :  { %v1948_v25 = vmul.f32 %v1572_v19, %v290_v23 }
 0x2c2   :  { %302 = vrot.lane.b32.xlu1 %v1948_v25, %s1672_s1 }
 0x334   :  { %v303_v29 = vpop.permute.xlu1 %302 }
 0x335   :  { %306 = vst.msk [vmem:[#allocation2 + $0x4] sm:$0xf] %vm184_vm10, %v303_v29  ;;  %1494 = vmatmul.msk.f32.vlgmr.msrb.gmra.mxu0 %vm86_vm11, %v303_v29  ;;  %1495 = vmatmul.msk.f32.vlgmr.msrb.gmra.mxu1 %vm86_vm11, %v303_v29 }
 0x336   :  { %818 = vmatpush.msrb.mxu0 %v1719_v0  ;;  %838 = vmatpush.msrb.mxu1 %v1730_v2 }
 0x338   :  { %819 = vmatpush.msrb.mxu0 %v1724_v1  ;;  %839 = vmatpush.msrb.mxu1 %v1742_v4 }
 0x33a   :  { %820 = vmatpush.msrb.mxu0 %v1736_v3  ;;  %840 = vmatpush.msrb.mxu1 %v1749_v5 }
 0x33c   :  { %821 = vmatpush.msrb.mxu0 %v1755_v6  ;;  %841 = vmatpush.msrb.mxu1 %v1763_v7 }
 0x33e   :  { %822 = vmatpush.msrb.mxu0 %v1772_v9  ;;  %842 = vmatpush.msrb.mxu1 %v1780_v10 }
 0x340   :  { %823 = vmatpush.msrb.mxu0 %v1786_v11  ;;  %843 = vmatpush.msrb.mxu1 %v1794_v12 }
 0x342   :  { %824 = vmatpush.msrb.mxu0 %v1800_v13  ;;  %844 = vmatpush.msrb.mxu1 %v1808_v14 }
 0x344   :  { %825 = vmatpush.msrb.mxu0 %v1817_v16  ;;  %845 = vmatpush.msrb.mxu1 %v1823_v17 }
 0x3b2   :  { %v349_v32 = vpop.f32.mrf.mxu0  ;;  %v369_v40 = vpop.f32.mrf.mxu1 }
 0x3b3   :  { %v372_v33 = vadd.f32 %v349_v32, %v328_v31  ;;  %v373_v42 = vadd.f32 %v369_v40, %v329_v39  ;;  %v1499_v32 = vld [vmem:[%s2281_s0 + $0x20] sm:$0xff] }
 0x3b5   :  { %v1496_v35 = vmul.f32 -1.442695, %v372_v33  ;;  %v1497_v54 = vmul.f32 -1.442695, %v373_v42 }
 0x3b7   :  { %1573 = vpow2.f32 %v1496_v35 }
 0x3bd   :  { %v1574_v36 = vpop.eup %1573 }
 0x3be   :  { %v377_v37 = vadd.f32 1.0, %v1574_v36 }
 0x3c0   :  { %1575 = vrcp.f32 %v377_v37  ;;  %v389_v45 = vand.u32 2147483648, %v377_v37  ;;  %v387_v47 = vand.u32 2147483647, %v377_v37  ;;  %vm383_vm7 = vweird.f32 %v377_v37 }
 0x3c1   :  { %1577 = vtanh.f32 %v373_v42 }
 0x3c2   :  { %v390_v49 = vor.u32 1.1754944e-38, %v389_v45  ;;  %vm388_vm9 = vcmp.eq.f32.partialorder %v387_v47, 8.507059e+37  ;;  %1579 = vpow2.f32 %v1497_v54 }
 0x3c6   :  { %v1576_v41 = vpop.eup %1575 }
 0x3c7   :  { %v379_v43 = vmul.f32 %v1576_v41, %v377_v37  ;;  %vm384_vm6 = vweird.f32 %v1576_v41  ;;  %v1578_v51 = vpop.eup %1577 }
 0x3c8   :  { %vm385_vm8 = vmor %vm383_vm7, %vm384_vm6  ;;  %v1580_v55 = vpop.eup %1579 }
 0x3c9   :  { %v380_v44 = vsub.f32 1.0, %v379_v43  ;;  %v397_v56 = vadd.f32 1.0, %v1580_v55 }
 0x3cb   :  { %v381_v46 = vmul.f32 %v1576_v41, %v380_v44  ;;  %1581 = vrcp.f32 %v397_v56  ;;  %v409_v19 = vand.u32 2147483648, %v397_v56  ;;  %vm403_vm13 = vweird.f32 %v397_v56 }
 0x3cc   :  { %v407_v23 = vand.u32 2147483647, %v397_v56 }
 0x3cd   :  { %v382_v48 = vadd.f32 %v1576_v41, %v381_v46  ;;  %v410_v28 = vor.u32 1.1754944e-38, %v409_v19 }
 0x3ce   :  { %vm408_vm15 = vcmp.eq.f32.partialorder %v407_v23, 8.507059e+37 }
 0x3cf   :  { %v386_v50 = vsel %vm385_vm8, %v1576_v41, %v382_v48 }
 0x3d0   :  { %v391_v52 = vsel %vm388_vm9, %v390_v49, %v386_v50 }
 0x3d1   :  { %v414_v53 = vmul.f32 %v1578_v51, %v391_v52  ;;  %v1582_v57 = vpop.eup %1581  ;;  %v413_v63 = vmul.f32 %v391_v52, %v1945_v61  ;;  %v1999_v61 = vld [vmem:[%s2281_s0 + $0x18] sm:$0xff] }
 0x3d2   :  { %v399_v58 = vmul.f32 %v1582_v57, %v397_v56  ;;  %vm404_vm12 = vweird.f32 %v1582_v57  ;;  %438 = vst [vmem:[#allocation1] ss:$2 sm:$0xff] %v1999_v61 }
 0x3d3   :  { %416 = vrot.lane.b32.xlu2 %v414_v53, %s1672_s1  ;;  %vm405_vm14 = vmor %vm403_vm13, %vm404_vm12 }
 0x3d4   :  { %v400_v59 = vsub.f32 1.0, %v399_v58 }
 0x3d6   :  { %v401_v62 = vmul.f32 %v1582_v57, %v400_v59 }
 0x3d8   :  { %v402_v18 = vadd.f32 %v1582_v57, %v401_v62 }
 0x3d9   :  { %v439_v33 = vld.sshfl [vmem:[#allocation1] sm:$0xff pattern:$0x75316420]  ;;  %v440_v35 = vld.sshfl [vmem:[#allocation1 + $0x8] sm:$0xff pattern:$0x75316420] }
 0x3da   :  { %v406_v27 = vsel %vm405_vm14, %v1582_v57, %v402_v18  ;;  %444 = vst [vmem:[#allocation1] ss:$2 sm:$0xff] %v1499_v32 }
 0x3db   :  { %v411_v30 = vsel %vm408_vm15, %v410_v28, %v406_v27 }
 0x42d   :  { %v417_v8 = vpop.permute.xlu2 %416 }
 0x42e   :  { %v1989_v15 = vadd.f32 %v417_v8, %v413_v63 }
 0x430   :  { %1583 = vtanh.f32 %v1989_v15 }
 0x436   :  { %v1584_v29 = vpop.eup %1583 }
 0x437   :  { %v1992_v31 = vmul.f32 %v1584_v29, %v411_v30 }
 0x439   :  { %423 = vrot.lane.b32.xlu2 %v1992_v31, %s1672_s1 }
 0x493   :  { %v424_v36 = vpop.permute.xlu2 %423 }
 0x494   :  { %427 = vst.msk [vmem:[#allocation2 + $0x8] sm:$0xf] %vm184_vm10, %v424_v36  ;;  %1500 = vmatmul.msk.f32.vlgmr.msrb.gmra.mxu2 %vm86_vm11, %v424_v36  ;;  %1501 = vmatmul.msk.f32.vlgmr.msrb.gmra.mxu3 %vm86_vm11, %v424_v36 }
 0x495   :  { %937 = vmatpush.msrb.mxu2 %v1719_v0  ;;  %957 = vmatpush.msrb.mxu3 %v1730_v2  ;;  %v445_v0 = vld.sshfl [vmem:[#allocation1] sm:$0xff pattern:$0x75316420] }
 0x496   :  { %v449_v2 = vsel %vm1886_vm0, %v439_v33, %v445_v0 }
 0x497   :  { %938 = vmatpush.msrb.mxu2 %v1724_v1  ;;  %958 = vmatpush.msrb.mxu3 %v1742_v4  ;;  %v446_v1 = vld.sshfl [vmem:[#allocation1 + $0x8] sm:$0xff pattern:$0x75316420] }
 0x498   :  { %557 = vst [vmem:[#allocation1] ss:$2 sm:$0xff] %v1499_v32 }
 0x499   :  { %939 = vmatpush.msrb.mxu2 %v1736_v3  ;;  %959 = vmatpush.msrb.mxu3 %v1749_v5 }
 0x49b   :  { %940 = vmatpush.msrb.mxu2 %v1755_v6  ;;  %960 = vmatpush.msrb.mxu3 %v1763_v7 }
 0x49d   :  { %941 = vmatpush.msrb.mxu2 %v1772_v9  ;;  %961 = vmatpush.msrb.mxu3 %v1780_v10  ;;  %v450_v9 = vsel %vm1893_vm1, %v440_v35, %v446_v1 }
 0x49f   :  { %942 = vmatpush.msrb.mxu2 %v1786_v11  ;;  %962 = vmatpush.msrb.mxu3 %v1794_v12  ;;  %v558_v8 = vld.sshfl [vmem:[#allocation1] sm:$0xff pattern:$0x75316420] }
 0x4a1   :  { %943 = vmatpush.msrb.mxu2 %v1800_v13  ;;  %963 = vmatpush.msrb.mxu3 %v1808_v14 }
 0x4a3   :  { %944 = vmatpush.msrb.mxu2 %v1817_v16  ;;  %964 = vmatpush.msrb.mxu3 %v1823_v17 }
 0x517   :  { %v470_v3 = vpop.f32.mrf.mxu2  ;;  %v490_v10 = vpop.f32.mrf.mxu3 }
 0x518   :  { %v493_v4 = vadd.f32 %v470_v3, %v449_v2  ;;  %v494_v12 = vadd.f32 %v490_v10, %v450_v9 }
 0x51a   :  { %v1502_v5 = vmul.f32 -1.442695, %v493_v4  ;;  %v1503_v44 = vmul.f32 -1.442695, %v494_v12 }
 0x51c   :  { %1585 = vpow2.f32 %v1502_v5 }
 0x522   :  { %v1586_v6 = vpop.eup %1585 }
 0x523   :  { %v498_v7 = vadd.f32 1.0, %v1586_v6 }
 0x525   :  { %1587 = vrcp.f32 %v498_v7  ;;  %v510_v16 = vand.u32 2147483648, %v498_v7  ;;  %v508_v37 = vand.u32 2147483647, %v498_v7  ;;  %vm504_vm3 = vweird.f32 %v498_v7 }
 0x526   :  { %1589 = vtanh.f32 %v494_v12 }
 0x527   :  { %v511_v39 = vor.u32 1.1754944e-38, %v510_v16  ;;  %vm509_vm5 = vcmp.eq.f32.partialorder %v508_v37, 8.507059e+37  ;;  %1591 = vpow2.f32 %v1503_v44 }
 0x52b   :  { %v1588_v11 = vpop.eup %1587 }
 0x52c   :  { %v500_v13 = vmul.f32 %v1588_v11, %v498_v7  ;;  %vm505_vm2 = vweird.f32 %v1588_v11  ;;  %v1590_v41 = vpop.eup %1589 }
 0x52d   :  { %vm506_vm4 = vmor %vm504_vm3, %vm505_vm2  ;;  %v1592_v45 = vpop.eup %1591 }
 0x52e   :  { %v501_v14 = vsub.f32 1.0, %v500_v13  ;;  %v518_v46 = vadd.f32 1.0, %v1592_v45 }
 0x530   :  { %v502_v17 = vmul.f32 %v1588_v11, %v501_v14  ;;  %1593 = vrcp.f32 %v518_v46  ;;  %v530_v55 = vand.u32 2147483648, %v518_v46  ;;  %vm524_vm7 = vweird.f32 %v518_v46 }
 0x531   :  { %v528_v56 = vand.u32 2147483647, %v518_v46 }
 0x532   :  { %v503_v38 = vadd.f32 %v1588_v11, %v502_v17  ;;  %v531_v58 = vor.u32 1.1754944e-38, %v530_v55 }
 0x533   :  { %vm529_vm9 = vcmp.eq.f32.partialorder %v528_v56, 8.507059e+37 }
 0x534   :  { %v507_v40 = vsel %vm506_vm4, %v1588_v11, %v503_v38 }
 0x535   :  { %v512_v42 = vsel %vm509_vm5, %v511_v39, %v507_v40 }
 0x536   :  { %v535_v43 = vmul.f32 %v1590_v41, %v512_v42  ;;  %v1594_v47 = vpop.eup %1593  ;;  %v534_v51 = vmul.f32 %v512_v42, %v1989_v15  ;;  %v559_v15 = vld.sshfl [vmem:[#allocation1 + $0x8] sm:$0xff pattern:$0x75316420] }
 0x537   :  { %v520_v48 = vmul.f32 %v1594_v47, %v518_v46  ;;  %vm525_vm6 = vweird.f32 %v1594_v47  ;;  %563 = vst [vmem:[#allocation1] ss:$2 sm:$0xff] %v1999_v61 }
 0x538   :  { %537 = vrot.lane.b32.xlu0 %v535_v43, %s1672_s1  ;;  %vm526_vm8 = vmor %vm524_vm7, %vm525_vm6 }
 0x539   :  { %v521_v49 = vsub.f32 1.0, %v520_v48 }
 0x53b   :  { %v522_v50 = vmul.f32 %v1594_v47, %v521_v49 }
 0x53d   :  { %v523_v54 = vadd.f32 %v1594_v47, %v522_v50 }
 0x53e   :  { %v564_v19 = vld.sshfl [vmem:[#allocation1] sm:$0xff pattern:$0x75316420]  ;;  %v565_v23 = vld.sshfl [vmem:[#allocation1 + $0x8] sm:$0xff pattern:$0x75316420] }
 0x53f   :  { %v527_v57 = vsel %vm526_vm8, %v1594_v47, %v523_v54  ;;  %676 = vst [vmem:[#allocation1] ss:$2 sm:$0xff] %v1961_v26  ;;  %v568_v27 = vsel %vm1886_vm0, %v558_v8, %v564_v19  ;;  %v569_v33 = vsel %vm1893_vm1, %v559_v15, %v565_v23 }
 0x540   :  { %v532_v62 = vsel %vm529_vm9, %v531_v58, %v527_v57 }
 0x546   :  { %v677_v50 = vld.sshfl [vmem:[#allocation1] sm:$0xff pattern:$0x75316420] }
 0x5aa   :  { %v538_v52 = vpop.permute.xlu0 %537 }
 0x5ab   :  { %v2030_v53 = vadd.f32 %v538_v52, %v534_v51  ;;  %v678_v51 = vld.sshfl [vmem:[#allocation1 + $0x8] sm:$0xff pattern:$0x75316420] }
 0x5ac   :  { %682 = vst [vmem:[#allocation1] ss:$2 sm:$0xff] %v1955_v60 }
 0x5ad   :  { %1595 = vtanh.f32 %v2030_v53 }
 0x5b3   :  { %v1596_v59 = vpop.eup %1595  ;;  %v684_v54 = vld.sshfl [vmem:[#allocation1 + $0x8] sm:$0xff pattern:$0x75316420] }
 0x5b4   :  { %v2033_v63 = vmul.f32 %v1596_v59, %v532_v62  ;;  %v688_v62 = vsel %vm1893_vm1, %v678_v51, %v684_v54 }
 0x5b6   :  { %544 = vrot.lane.b32.xlu1 %v2033_v63, %s1672_s1 }
 0x628   :  { %v545_v18 = vpop.permute.xlu1 %544 }
 0x629   :  { %548 = vst.msk [vmem:[#allocation2 + $0xc] sm:$0xf] %vm184_vm10, %v545_v18  ;;  %1506 = vmatmul.msk.f32.vlgmr.msra.gmra.mxu0 %vm86_vm11, %v545_v18  ;;  %1507 = vmatmul.msk.f32.vlgmr.msra.gmra.mxu1 %vm86_vm11, %v545_v18 }
 0x6a6   :  { %v589_v28 = vpop.f32.mrf.mxu0  ;;  %v609_v35 = vpop.f32.mrf.mxu1 }
 0x6a7   :  { %v612_v29 = vadd.f32 %v589_v28, %v568_v27  ;;  %v613_v0 = vadd.f32 %v609_v35, %v569_v33 }
 0x6a9   :  { %v1508_v30 = vmul.f32 -1.442695, %v612_v29  ;;  %v1509_v12 = vmul.f32 -1.442695, %v613_v0 }
 0x6ab   :  { %1597 = vpow2.f32 %v1508_v30 }
 0x6b1   :  { %v1598_v32 = vpop.eup %1597 }
 0x6b2   :  { %v617_v61 = vadd.f32 1.0, %v1598_v32 }
 0x6b4   :  { %1599 = vrcp.f32 %v617_v61  ;;  %v629_v26 = vand.u32 2147483648, %v617_v61  ;;  %v627_v4 = vand.u32 2147483647, %v617_v61  ;;  %vm623_vm13 = vweird.f32 %v617_v61 }
 0x6b5   :  { %1601 = vtanh.f32 %v613_v0 }
 0x6b6   :  { %v630_v6 = vor.u32 1.1754944e-38, %v629_v26  ;;  %vm628_vm15 = vcmp.eq.f32.partialorder %v627_v4, 8.507059e+37  ;;  %1603 = vpow2.f32 %v1509_v12 }
 0x6ba   :  { %v1600_v36 = vpop.eup %1599 }
 0x6bb   :  { %v619_v1 = vmul.f32 %v1600_v36, %v617_v61  ;;  %vm624_vm12 = vweird.f32 %v1600_v36  ;;  %v1602_v9 = vpop.eup %1601 }
 0x6bc   :  { %vm625_vm14 = vmor %vm623_vm13, %vm624_vm12  ;;  %v1604_v13 = vpop.eup %1603 }
 0x6bd   :  { %v620_v2 = vsub.f32 1.0, %v619_v1  ;;  %v637_v14 = vadd.f32 1.0, %v1604_v13 }
 0x6bf   :  { %v621_v3 = vmul.f32 %v1600_v36, %v620_v2  ;;  %1605 = vrcp.f32 %v637_v14  ;;  %v649_v43 = vand.u32 2147483648, %v637_v14  ;;  %vm643_vm3 = vweird.f32 %v637_v14 }
 0x6c0   :  { %v647_v44 = vand.u32 2147483647, %v637_v14 }
 0x6c1   :  { %v622_v5 = vadd.f32 %v1600_v36, %v621_v3  ;;  %v650_v46 = vor.u32 1.1754944e-38, %v649_v43 }
 0x6c2   :  { %vm648_vm5 = vcmp.eq.f32.partialorder %v647_v44, 8.507059e+37  ;;  %v1045_v44 = vld [vmem:[#allocation2] sm:$0xf] }
 0x6c3   :  { %v626_v7 = vsel %vm625_vm14, %v1600_v36, %v622_v5 }
 0x6c4   :  { %v631_v10 = vsel %vm628_vm15, %v630_v6, %v626_v7 }
 0x6c5   :  { %v654_v11 = vmul.f32 %v1602_v9, %v631_v10  ;;  %v1606_v16 = vpop.eup %1605  ;;  %v653_v39 = vmul.f32 %v631_v10, %v2030_v53  ;;  %v683_v53 = vld.sshfl [vmem:[#allocation1] sm:$0xff pattern:$0x75316420] }
 0x6c6   :  { %v639_v17 = vmul.f32 %v1606_v16, %v637_v14  ;;  %vm644_vm2 = vweird.f32 %v1606_v16  ;;  %795 = vst [vmem:[#allocation1] ss:$2 sm:$0xff] %v1917_v22  ;;  %v687_v55 = vsel %vm1886_vm0, %v677_v50, %v683_v53 }
 0x6c7   :  { %656 = vrot.lane.b32.xlu2 %v654_v11, %s1672_s1  ;;  %vm645_vm4 = vmor %vm643_vm3, %vm644_vm2  ;;  %vm1047_vm2 = vcmask 261120  }
 0x6c8   :  { %v640_v37 = vsub.f32 1.0, %v639_v17 }
 0x6ca   :  { %v641_v38 = vmul.f32 %v1606_v16, %v640_v37  ;;  %v2076_v37 = vld [vmem:[%s2283_s2 + $0x18] sm:$0xff] }
 0x6cb   :  { %1086 = vmatpush.msra.mxu1 %v2076_v37 }
 0x6cc   :  { %v642_v42 = vadd.f32 %v1606_v16, %v641_v38  ;;  %v2081_v38 = vld [vmem:[%s2283_s2 + $0x10] sm:$0xff] }
 0x6cd   :  { %1087 = vmatpush.msra.mxu1 %v2081_v38 }
 0x6ce   :  { %v646_v45 = vsel %vm645_vm4, %v1606_v16, %v642_v42  ;;  %v797_v42 = vld.sshfl [vmem:[#allocation1 + $0x8] sm:$0xff pattern:$0x75316420] }
 0x6cf   :  { %v651_v48 = vsel %vm648_vm5, %v650_v46, %v646_v45 }
 0x721   :  { %v657_v40 = vpop.permute.xlu2 %656 }
 0x722   :  { %v2048_v41 = vadd.f32 %v657_v40, %v653_v39  ;;  %v2088_v39 = vld [vmem:[%s2283_s2 + $0x8] sm:$0xff]  ;;  %v2095_v40 = vld [vmem:[%s2283_s2] sm:$0xff]  ;;  %s1673_s2 = smov 32  }
 0x723   :  { %1088 = vmatpush.msra.mxu1 %v2088_v39 }
 0x724   :  { %1607 = vtanh.f32 %v2048_v41 }
 0x725   :  { %1089 = vmatpush.msra.mxu1 %v2095_v40 }
 0x72a   :  { %v1608_v47 = vpop.eup %1607 }
 0x72b   :  { %v2051_v49 = vmul.f32 %v1608_v47, %v651_v48 }
 0x72d   :  { %663 = vrot.lane.b32.xlu0 %v2051_v49, %s1672_s1 }
 0x79f   :  { %v664_v52 = vpop.permute.xlu0 %663 }
 0x7a0   :  { %667 = vst.msk [vmem:[#allocation2 + $0x10] sm:$0xf] %vm184_vm10, %v664_v52  ;;  %1512 = vmatmul.msk.f32.vlgmr.msra.gmra.mxu2 %vm86_vm11, %v664_v52  ;;  %1513 = vmatmul.msk.f32.vlgmr.msra.gmra.mxu3 %vm86_vm11, %v664_v52 }
 0x7a1   :  { %1140 = vmatpush.msra.mxu3 %v2076_v37 }
 0x7a3   :  { %1141 = vmatpush.msra.mxu3 %v2081_v38 }
 0x7a5   :  { %1142 = vmatpush.msra.mxu3 %v2088_v39 }
 0x7a7   :  { %1143 = vmatpush.msra.mxu3 %v2095_v40  ;;  %v1253_v45 = vld [vmem:[#allocation2 + $0x10] sm:$0xf] }
 0x823   :  { %v708_v56 = vpop.f32.mrf.mxu2  ;;  %v728_v8 = vpop.f32.mrf.mxu3 }
 0x824   :  { %v731_v57 = vadd.f32 %v708_v56, %v687_v55  ;;  %v732_v18 = vadd.f32 %v728_v8, %v688_v62 }
 0x826   :  { %v1514_v58 = vmul.f32 -1.442695, %v731_v57  ;;  %v1515_v36 = vmul.f32 -1.442695, %v732_v18 }
 0x828   :  { %1609 = vpow2.f32 %v1514_v58 }
 0x82e   :  { %v1610_v59 = vpop.eup %1609 }
 0x82f   :  { %v736_v60 = vadd.f32 1.0, %v1610_v59 }
 0x831   :  { %1611 = vrcp.f32 %v736_v60  ;;  %v748_v22 = vand.u32 2147483648, %v736_v60  ;;  %v746_v28 = vand.u32 2147483647, %v736_v60  ;;  %vm742_vm7 = vweird.f32 %v736_v60 }
 0x832   :  { %1613 = vtanh.f32 %v732_v18 }
 0x833   :  { %v749_v30 = vor.u32 1.1754944e-38, %v748_v22  ;;  %vm747_vm9 = vcmp.eq.f32.partialorder %v746_v28, 8.507059e+37  ;;  %1615 = vpow2.f32 %v1515_v36 }
 0x837   :  { %v1612_v15 = vpop.eup %1611 }
 0x838   :  { %v738_v19 = vmul.f32 %v1612_v15, %v736_v60  ;;  %vm743_vm6 = vweird.f32 %v1612_v15  ;;  %v1614_v61 = vpop.eup %1613 }
 0x839   :  { %vm744_vm8 = vmor %vm742_vm7, %vm743_vm6  ;;  %v1616_v0 = vpop.eup %1615 }
 0x83a   :  { %v739_v23 = vsub.f32 1.0, %v738_v19  ;;  %v756_v1 = vadd.f32 1.0, %v1616_v0 }
 0x83c   :  { %v740_v27 = vmul.f32 %v1612_v15, %v739_v23  ;;  %1617 = vrcp.f32 %v756_v1  ;;  %v768_v10 = vand.u32 2147483648, %v756_v1  ;;  %vm762_vm13 = vweird.f32 %v756_v1 }
 0x83d   :  { %v766_v11 = vand.u32 2147483647, %v756_v1 }
 0x83e   :  { %v741_v29 = vadd.f32 %v1612_v15, %v740_v27  ;;  %v769_v13 = vor.u32 1.1754944e-38, %v768_v10 }
 0x83f   :  { %vm767_vm15 = vcmp.eq.f32.partialorder %v766_v11, 8.507059e+37 }
 0x840   :  { %v745_v32 = vsel %vm744_vm8, %v1612_v15, %v741_v29 }
 0x841   :  { %v750_v33 = vsel %vm747_vm9, %v749_v30, %v745_v32 }
 0x842   :  { %v773_v35 = vmul.f32 %v1614_v61, %v750_v33  ;;  %v1618_v2 = vpop.eup %1617  ;;  %v772_v5 = vmul.f32 %v750_v33, %v2048_v41  ;;  %v796_v41 = vld.sshfl [vmem:[#allocation1] sm:$0xff pattern:$0x75316420] }
 0x843   :  { %v758_v26 = vmul.f32 %v1618_v2, %v756_v1  ;;  %vm763_vm12 = vweird.f32 %v1618_v2  ;;  %801 = vst [vmem:[#allocation1] ss:$2 sm:$0xff] %v1911_v21  ;;  %v1151_v21 = vld [vmem:[#allocation2 + $0x8] sm:$0xf] }
 0x844   :  { %775 = vrot.lane.b32.xlu1 %v773_v35, %s1672_s1  ;;  %vm764_vm14 = vmor %vm762_vm13, %vm763_vm12 }
 0x845   :  { %v759_v3 = vsub.f32 1.0, %v758_v26 }
 0x847   :  { %v760_v4 = vmul.f32 %v1618_v2, %v759_v3 }
 0x849   :  { %v761_v9 = vadd.f32 %v1618_v2, %v760_v4 }
 0x84a   :  { %v802_v46 = vld.sshfl [vmem:[#allocation1] sm:$0xff pattern:$0x75316420]  ;;  %v803_v54 = vld.sshfl [vmem:[#allocation1 + $0x8] sm:$0xff pattern:$0x75316420] }
 0x84b   :  { %v765_v12 = vsel %vm764_vm14, %v1618_v2, %v761_v9  ;;  %v806_v47 = vsel %vm1886_vm0, %v796_v41, %v802_v46  ;;  %v807_v55 = vsel %vm1893_vm1, %v797_v42, %v803_v54  ;;  %v912_v41 = vld [vmem:[%s2281_s0] sm:$0xff] }
 0x84c   :  { %v770_v16 = vsel %vm767_vm15, %v769_v13, %v765_v12  ;;  %v2143_v12 = vld [vmem:[%s2284_s3 + $0x10] sm:$0xff]  ;;  %v2150_v13 = vld [vmem:[%s2284_s3 + $0x8] sm:$0xff] }
 0x8b6   :  { %v776_v6 = vpop.permute.xlu1 %775 }
 0x8b7   :  { %v2066_v7 = vadd.f32 %v776_v6, %v772_v5 }
 0x8b9   :  { %1619 = vtanh.f32 %v2066_v7 }
 0x8bf   :  { %v1620_v14 = vpop.eup %1619 }
 0x8c0   :  { %v2069_v17 = vmul.f32 %v1620_v14, %v770_v16  ;;  %v1522_v14 = vld [vmem:[%s2281_s0 + $0x38] sm:$0xff] }
 0x8c1   :  { %914 = vst [vmem:[#allocation1] ss:$2 sm:$0xff] %v1522_v14 }
 0x8c2   :  { %782 = vrot.lane.b32.xlu2 %v2069_v17, %s1672_s1 }
 0x8c8   :  { %v915_v42 = vld.sshfl [vmem:[#allocation1] sm:$0xff pattern:$0x75316420] }
 0x91c   :  { %v783_v43 = vpop.permute.xlu2 %782 }
 0x91d   :  { %786 = vst.msk [vmem:[#allocation2 + $0x14] sm:$0xf] %vm184_vm10, %v783_v43  ;;  %1518 = vmatmul.msk.f32.vlgmr.msrb.gmra.mxu0 %vm86_vm11, %v783_v43  ;;  %1519 = vmatmul.msk.f32.vlgmr.msrb.gmra.mxu1 %vm86_vm11, %v783_v43  ;;  %v916_v43 = vld.sshfl [vmem:[#allocation1 + $0x8] sm:$0xff pattern:$0x75316420] }
 0x91e   :  { %1191 = vmatpush.msrb.mxu1 %v2076_v37  ;;  %920 = vst [vmem:[#allocation1] ss:$2 sm:$0xff] %v912_v41 }
 0x920   :  { %1192 = vmatpush.msrb.mxu1 %v2081_v38 }
 0x922   :  { %1193 = vmatpush.msrb.mxu1 %v2088_v39 }
 0x924   :  { %1194 = vmatpush.msrb.mxu1 %v2095_v40 }
 0x925   :  { %1528 = vmatmul.msk.f32.vlgmr.msra.gmra.mxu1 %vm1047_vm2, %v1045_v44  ;;  %v922_v24 = vld.sshfl [vmem:[#allocation1 + $0x8] sm:$0xff pattern:$0x75316420] }
 0x926   :  { %1293 = vmatpush.msra.mxu1 %v2076_v37 }
 0x928   :  { %1294 = vmatpush.msra.mxu1 %v2081_v38 }
 0x92a   :  { %1295 = vmatpush.msra.mxu1 %v2088_v39 }
 0x92c   :  { %1296 = vmatpush.msra.mxu1 %v2095_v40 }
 0x92d   :  { %1532 = vmatmul.msk.f32.vlgmr.msrb.gmra.mxu1 %vm1047_vm2, %v1151_v21 }
 0x92e   :  { %1395 = vmatpush.msrb.mxu1 %v2076_v37 }
 0x930   :  { %1396 = vmatpush.msrb.mxu1 %v2081_v38 }
 0x932   :  { %1397 = vmatpush.msrb.mxu1 %v2088_v39 }
 0x934   :  { %1398 = vmatpush.msrb.mxu1 %v2095_v40 }
 0x935   :  { %1536 = vmatmul.msk.f32.vlgmr.msra.gmra.mxu1 %vm1047_vm2, %v1253_v45  ;;  %v1100_v45 = vld [vmem:[#allocation2 + $0x4] sm:$0xf] }
 0x99a   :  { %v827_v48 = vpop.f32.mrf.mxu0  ;;  %v847_v56 = vpop.f32.mrf.mxu1 }
 0x99b   :  { %v850_v50 = vadd.f32 %v827_v48, %v806_v47  ;;  %v851_v58 = vadd.f32 %v847_v56, %v807_v55  ;;  %v1202_v48 = vld [vmem:[#allocation2 + $0xc] sm:$0xf] }
 0x99d   :  { %v1520_v51 = vmul.f32 -1.442695, %v850_v50  ;;  %v1521_v29 = vmul.f32 -1.442695, %v851_v58  ;;  %v1304_v50 = vld [vmem:[#allocation2 + $0x14] sm:$0xf] }
 0x99f   :  { %1621 = vpow2.f32 %v1520_v51  ;;  %v921_v51 = vld.sshfl [vmem:[#allocation1] sm:$0xff pattern:$0x75316420] }
 0x9a5   :  { %v1622_v52 = vpop.eup %1621 }
 0x9a6   :  { %v855_v53 = vadd.f32 1.0, %v1622_v52  ;;  %v925_v52 = vsel %vm1886_vm0, %v915_v42, %v921_v51 }
 0x9a8   :  { %1623 = vrcp.f32 %v855_v53  ;;  %v867_v62 = vand.u32 2147483648, %v855_v53  ;;  %v865_v15 = vand.u32 2147483647, %v855_v53  ;;  %vm861_vm4 = vweird.f32 %v855_v53 }
 0x9a9   :  { %1625 = vtanh.f32 %v851_v58 }
 0x9aa   :  { %v868_v19 = vor.u32 1.1754944e-38, %v867_v62  ;;  %vm866_vm6 = vcmp.eq.f32.partialorder %v865_v15, 8.507059e+37  ;;  %1627 = vpow2.f32 %v1521_v29 }
 0x9ae   :  { %v1624_v57 = vpop.eup %1623 }
 0x9af   :  { %v857_v59 = vmul.f32 %v1624_v57, %v855_v53  ;;  %vm862_vm3 = vweird.f32 %v1624_v57  ;;  %v1626_v22 = vpop.eup %1625 }
 0x9b0   :  { %vm863_vm5 = vmor %vm861_vm4, %vm862_vm3  ;;  %v1628_v30 = vpop.eup %1627 }
 0x9b1   :  { %v858_v60 = vsub.f32 1.0, %v857_v59  ;;  %v875_v32 = vadd.f32 1.0, %v1628_v30 }
 0x9b3   :  { %v859_v8 = vmul.f32 %v1624_v57, %v858_v60  ;;  %1629 = vrcp.f32 %v875_v32  ;;  %v887_v3 = vand.u32 2147483648, %v875_v32  ;;  %vm881_vm8 = vweird.f32 %v875_v32 }
 0x9b4   :  { %v885_v4 = vand.u32 2147483647, %v875_v32  ;;  %v926_v60 = vsel %vm1893_vm1, %v916_v43, %v922_v24 }
 0x9b5   :  { %v860_v18 = vadd.f32 %v1624_v57, %v859_v8  ;;  %v888_v6 = vor.u32 1.1754944e-38, %v887_v3 }
 0x9b6   :  { %vm886_vm12 = vcmp.eq.f32.partialorder %v885_v4, 8.507059e+37 }
 0x9b7   :  { %v864_v23 = vsel %vm863_vm5, %v1624_v57, %v860_v18 }
 0x9b8   :  { %v869_v27 = vsel %vm866_vm6, %v868_v19, %v864_v23  ;;  %vm1029_vm6 = vcmask 519168  }
 0x9b9   :  { %v892_v28 = vmul.f32 %v1626_v22, %v869_v27  ;;  %v1630_v61 = vpop.eup %1629  ;;  %v891_v0 = vmul.f32 %v869_v27, %v2066_v7  ;;  %v2138_v7 = vld [vmem:[%s2284_s3 + $0x18] sm:$0xff] }
 0x9ba   :  { %v877_v33 = vmul.f32 %v1630_v61, %v875_v32  ;;  %vm882_vm7 = vweird.f32 %v1630_v61  ;;  %1117 = vmatpush.msra.mxu2 %v2138_v7  ;;  %1063 = vmatpush.msra.mxu0 %v2138_v7 }
 0x9bb   :  { %894 = vrot.lane.b32.xlu0 %v892_v28, %s1672_s1  ;;  %vm883_vm9 = vmor %vm881_vm8, %vm882_vm7 }
 0x9bc   :  { %v878_v35 = vsub.f32 1.0, %v877_v33  ;;  %1118 = vmatpush.msra.mxu2 %v2143_v12  ;;  %1064 = vmatpush.msra.mxu0 %v2143_v12 }
 0x9be   :  { %v879_v36 = vmul.f32 %v1630_v61, %v878_v35  ;;  %1119 = vmatpush.msra.mxu2 %v2150_v13  ;;  %1065 = vmatpush.msra.mxu0 %v2150_v13 }
 0x9c0   :  { %v880_v26 = vadd.f32 %v1630_v61, %v879_v36 }
 0x9c2   :  { %v884_v5 = vsel %vm883_vm9, %v1630_v61, %v880_v26 }
 0x9c3   :  { %v889_v10 = vsel %vm886_vm12, %v888_v6, %v884_v5 }
 0xa2d   :  { %v895_v1 = vpop.permute.xlu0 %894 }
 0xa2e   :  { %v2126_v2 = vadd.f32 %v895_v1, %v891_v0 }
 0xa30   :  { %1631 = vtanh.f32 %v2126_v2 }
 0xa36   :  { %v1632_v9 = vpop.eup %1631 }
 0xa37   :  { %v899_v11 = vmul.f32 %v1632_v9, %v889_v10 }
 0xa39   :  { %906 = vrot.lane.b32.xlu0 %v899_v11, %s1673_s2  ;;  %901 = vrot.lane.b32.xlu1 %v899_v11, %s1672_s1 }
 0xa41   :  { %787 = vrot.lane.b32.xlu0 %v2069_v17, %s1673_s2 }
 0xa49   :  { %186 = vrot.lane.b32.xlu0 %v1904_v20, %s1673_s2  ;;  %v2157_v20 = vld [vmem:[%s2284_s3] sm:$0xff] }
 0xa4a   :  { %1120 = vmatpush.msra.mxu2 %v2157_v20  ;;  %1066 = vmatpush.msra.mxu0 %v2157_v20 }
 0xa4c   :  { %1168 = vmatpush.msrb.mxu0 %v2138_v7 }
 0xa4e   :  { %1169 = vmatpush.msrb.mxu0 %v2143_v12 }
 0xa50   :  { %1170 = vmatpush.msrb.mxu0 %v2150_v13 }
 0xa52   :  { %1171 = vmatpush.msrb.mxu0 %v2157_v20 }
 0xaab   :  { %v907_v16 = vpop.permute.xlu0 %906  ;;  %v902_v17 = vpop.permute.xlu1 %901 }
 0xaac   :  { %910 = vst.msk [vmem:[#allocation3 + $0x4] sm:$0xf] %vm184_vm10, %v907_v16  ;;  %1523 = vmatmul.msk.f32.vlgmr.msrb.gmra.mxu2 %vm86_vm11, %v902_v17  ;;  %1524 = vmatmul.msk.f32.vlgmr.msrb.gmra.mxu3 %vm86_vm11, %v902_v17  ;;  %vm1098_vm11 = vcmask 125952  }
 0xaad   :  { %905 = vst.msk [vmem:[#allocation2 + $0x18] sm:$0xf] %vm184_vm10, %v902_v17  ;;  %1242 = vmatpush.msrb.mxu3 %v2076_v37  ;;  %1219 = vmatpush.msrb.mxu2 %v2138_v7 }
 0xaaf   :  { %1243 = vmatpush.msrb.mxu3 %v2081_v38  ;;  %1220 = vmatpush.msrb.mxu2 %v2143_v12 }
 0xab1   :  { %1244 = vmatpush.msrb.mxu3 %v2088_v39  ;;  %1221 = vmatpush.msrb.mxu2 %v2150_v13 }
 0xab3   :  { %v788_v44 = vpop.permute.xlu0 %787  ;;  %v1101_v21 = vld [vmem:[#allocation3 + $0x4] sm:$0xf]  ;;  %1245 = vmatpush.msrb.mxu3 %v2095_v40  ;;  %1222 = vmatpush.msrb.mxu2 %v2157_v20 }
 0xab4   :  { %791 = vst.msk [vmem:[#allocation3 + $0x8] sm:$0xf] %vm184_vm10, %v788_v44  ;;  %1529 = vmatmul.msk.f32.vlgmr.msra.gmra.mxu2 %vm1047_vm2, %v1101_v21  ;;  %1530 = vmatmul.msk.f32.vlgmr.msra.gmra.mxu3 %vm1047_vm2, %v1100_v45  ;;  %v1355_v46 = vld [vmem:[#allocation2 + $0x18] sm:$0xf] }
 0xab5   :  { %1540 = vmatmul.msk.f32.vlgmr.msrb.gmra.mxu1 %vm1047_vm2, %v1355_v46  ;;  %1344 = vmatpush.msra.mxu3 %v2076_v37 }
 0xab6   :  { %1321 = vmatpush.msra.mxu2 %v2138_v7 }
 0xab7   :  { %1345 = vmatpush.msra.mxu3 %v2081_v38 }
 0xab8   :  { %1322 = vmatpush.msra.mxu2 %v2143_v12 }
 0xab9   :  { %1346 = vmatpush.msra.mxu3 %v2088_v39 }
 0xaba   :  { %1323 = vmatpush.msra.mxu2 %v2150_v13 }
 0xabb   :  { %v187_v47 = vpop.permute.xlu0 %186  ;;  %1347 = vmatpush.msra.mxu3 %v2095_v40  ;;  %v1152_v45 = vld [vmem:[#allocation3 + $0x8] sm:$0xf] }
 0xabc   :  { %190 = vst.msk [vmem:[#allocation3 + $0x1c] sm:$0xf] %vm184_vm10, %v187_v47  ;;  %1534 = vmatmul.msk.f32.vlgmr.msrb.gmra.mxu3 %vm1047_vm2, %v1202_v48  ;;  %1324 = vmatpush.msra.mxu2 %v2157_v20 }
 0xabd   :  { %1446 = vmatpush.msrb.mxu3 %v2076_v37  ;;  %v2209_v37 = vld [vmem:[%s2285_s4] ss:$0 sm:$0xff] }
 0xabf   :  { %1447 = vmatpush.msrb.mxu3 %v2081_v38 }
 0xac1   :  { %1448 = vmatpush.msrb.mxu3 %v2088_v39 }
 0xac3   :  { %1449 = vmatpush.msrb.mxu3 %v2095_v40 }
 0xac4   :  { %1538 = vmatmul.msk.f32.vlgmr.msra.gmra.mxu3 %vm1047_vm2, %v1304_v50 }
 0xb2f   :  { %v946_v53 = vpop.f32.mrf.mxu2  ;;  %v966_v54 = vpop.f32.mrf.mxu3 }
 0xb30   :  { %v969_v55 = vadd.f32 %v946_v53, %v925_v52  ;;  %v970_v8 = vadd.f32 %v966_v54, %v926_v60  ;;  %v1407_v52 = vld [vmem:[#allocation3 + $0x1c] sm:$0xf] }
 0xb32   :  { %v1525_v56 = vmul.f32 -1.442695, %v969_v55  ;;  %v1526_v34 = vmul.f32 -1.442695, %v970_v8 }
 0xb34   :  { %1633 = vpow2.f32 %v1525_v56 }
 0xb37   :  { %v1122_v38 = vpop.f32.mrf.mxu2  ;;  %v1145_v39 = vpop.f32.mrf.mxu3 }
 0xb38   :  { %v1146_v57 = vadd.f32 %v1145_v39, %v1122_v38 }
 0xb3a   :  { %v1634_v40 = vpop.eup %1633  ;;  %v1148_v58 = vadd.f32 %v2209_v37, %v1146_v57 }
 0xb3b   :  { %v974_v59 = vadd.f32 1.0, %v1634_v40 }
 0xb3c   :  { %1150 = vst.msk [vmem:[#allocation4 + $0x4] sm:$0xf] %vm1098_vm11, %v1148_v58 }
 0xb3d   :  { %1635 = vrcp.f32 %v974_v59  ;;  %v986_v19 = vand.u32 2147483648, %v974_v59  ;;  %v984_v22 = vand.u32 2147483647, %v974_v59  ;;  %vm980_vm13 = vweird.f32 %v974_v59 }
 0xb3e   :  { %1637 = vtanh.f32 %v970_v8 }
 0xb3f   :  { %v987_v28 = vor.u32 1.1754944e-38, %v986_v19  ;;  %vm985_vm15 = vcmp.eq.f32.partialorder %v984_v22, 8.507059e+37  ;;  %1639 = vpow2.f32 %v1526_v34  ;;  %v1247_v47 = vpop.f32.mrf.mxu3 }
 0xb43   :  { %v1636_v62 = vpop.eup %1635 }
 0xb44   :  { %v976_v15 = vmul.f32 %v1636_v62, %v974_v59  ;;  %vm981_vm0 = vweird.f32 %v1636_v62  ;;  %v1638_v30 = vpop.eup %1637 }
 0xb45   :  { %vm982_vm14 = vmor %vm980_vm13, %vm981_vm0  ;;  %v1640_v33 = vpop.eup %1639 }
 0xb46   :  { %v977_v18 = vsub.f32 1.0, %v976_v15  ;;  %v994_v35 = vadd.f32 1.0, %v1640_v33 }
 0xb47   :  { %v1349_v40 = vpop.f32.mrf.mxu3 }
 0xb48   :  { %v978_v23 = vmul.f32 %v1636_v62, %v977_v18  ;;  %1641 = vrcp.f32 %v994_v35  ;;  %vm1000_vm3 = vweird.f32 %v994_v35 }
 0xb4a   :  { %v979_v27 = vadd.f32 %v1636_v62, %v978_v23 }
 0xb4c   :  { %v983_v29 = vsel %vm982_vm14, %v1636_v62, %v979_v27 }
 0xb4d   :  { %v988_v32 = vsel %vm985_vm15, %v987_v28, %v983_v29 }
 0xb4e   :  { %v1011_v61 = vmul.f32 %v1638_v30, %v988_v32  ;;  %v1642_v36 = vpop.eup %1641  ;;  %v1010_v3 = vmul.f32 %v988_v32, %v2126_v2 }
 0xb4f   :  { %v996_v0 = vmul.f32 %v1642_v36, %v994_v35  ;;  %vm1001_vm1 = vweird.f32 %v1642_v36 }
 0xb50   :  { %1013 = vrot.lane.b32.xlu2 %v1011_v61, %s1672_s1  ;;  %vm1002_vm4 = vmor %vm1000_vm3, %vm1001_vm1 }
 0xb51   :  { %v997_v1 = vsub.f32 1.0, %v996_v0 }
 0xb53   :  { %v998_v26 = vmul.f32 %v1642_v36, %v997_v1 }
 0xb58   :  { %668 = vrot.lane.b32.xlu2 %v2051_v49, %s1673_s2  ;;  %v999_v49 = vadd.f32 %v1642_v36, %v998_v26 }
 0xb5a   :  { %v1003_v6 = vsel %vm1002_vm4, %v1642_v36, %v999_v49 }
 0xb60   :  { %549 = vrot.lane.b32.xlu2 %v2033_v63, %s1673_s2  ;;  %v1006_v63 = vand.u32 2147483648, %v994_v35 }
 0xb62   :  { %v1007_v9 = vor.u32 1.1754944e-38, %v1006_v63 }
 0xb68   :  { %307 = vrot.lane.b32.xlu2 %v1948_v25, %s1673_s2  ;;  %v1004_v25 = vand.u32 2147483647, %v994_v35 }
 0xb6a   :  { %vm1005_vm5 = vcmp.eq.f32.partialorder %v1004_v25, 8.507059e+37 }
 0xb6b   :  { %v1008_v14 = vsel %vm1005_vm5, %v1007_v9, %v1003_v6 }
 0xbaa   :  { %v1014_v4 = vpop.permute.xlu2 %1013 }
 0xbab   :  { %v1016_v5 = vadd.f32 %v1014_v4, %v1010_v3 }
 0xbad   :  { %1643 = vtanh.f32 %v1016_v5  ;;  %1032 = vrot.lane.b32.xlu0 %v1016_v5, %s1672_s1 }
 0xbb2   :  { %v669_v10 = vpop.permute.xlu2 %668 }
 0xbb3   :  { %v1644_v11 = vpop.eup %1643  ;;  %672 = vst.msk [vmem:[#allocation3 + $0xc] sm:$0xf] %vm184_vm10, %v669_v10 }
 0xbb4   :  { %v1018_v2 = vmul.f32 %v1644_v11, %v1008_v14 }
 0xbb6   :  { %1025 = vrot.lane.b32.xlu1 %v1018_v2, %s1673_s2 }
 0xbba   :  { %v550_v16 = vpop.permute.xlu2 %549  ;;  %v1203_v17 = vld [vmem:[#allocation3 + $0xc] sm:$0xf] }
 0xbbb   :  { %553 = vst.msk [vmem:[#allocation3 + $0x10] sm:$0xf] %vm184_vm10, %v550_v16  ;;  %1533 = vmatmul.msk.f32.vlgmr.msrb.gmra.mxu2 %vm1047_vm2, %v1203_v17 }
 0xbbc   :  { %1423 = vmatpush.msrb.mxu2 %v2138_v7 }
 0xbbe   :  { %428 = vrot.lane.b32.xlu1 %v1992_v31, %s1673_s2  ;;  %1424 = vmatpush.msrb.mxu2 %v2143_v12 }
 0xbc0   :  { %1425 = vmatpush.msrb.mxu2 %v2150_v13 }
 0xbc2   :  { %v308_v41 = vpop.permute.xlu2 %307  ;;  %1426 = vmatpush.msrb.mxu2 %v2157_v20  ;;  %v1254_v51 = vld [vmem:[#allocation3 + $0x10] sm:$0xf] }
 0xbc3   :  { %311 = vst.msk [vmem:[#allocation3 + $0x18] sm:$0xf] %vm184_vm10, %v308_v41 }
 0xbc6   :  { %1020 = vrot.lane.b32.xlu1 %v1018_v2, %s1672_s1 }
 0xc1f   :  { %v1033_v42 = vpop.permute.xlu0 %1032 }
 0xc20   :  { %1035 = vst.msk [vmem:[%s2288_s7] sm:$0xf] %vm1029_vm6, %v1033_v42 }
 0xc28   :  { %v1026_v43 = vpop.permute.xlu1 %1025 }
 0xc29   :  { %1028 = vst.msk [vmem:[#allocation3] sm:$0xf] %vm184_vm10, %v1026_v43 }
 0xc30   :  { %v429_v31 = vpop.permute.xlu1 %428  ;;  %v1046_v44 = vld [vmem:[#allocation3] sm:$0xf] }
 0xc31   :  { %432 = vst.msk [vmem:[#allocation3 + $0x14] sm:$0xf] %vm184_vm10, %v429_v31  ;;  %1527 = vmatmul.msk.f32.vlgmr.msra.gmra.mxu0 %vm1047_vm2, %v1046_v44 }
 0xc32   :  { %1270 = vmatpush.msra.mxu0 %v2138_v7 }
 0xc34   :  { %1271 = vmatpush.msra.mxu0 %v2143_v12 }
 0xc36   :  { %1272 = vmatpush.msra.mxu0 %v2150_v13 }
 0xc38   :  { %v1021_v21 = vpop.permute.xlu1 %1020  ;;  %v1305_v46 = vld [vmem:[#allocation3 + $0x14] sm:$0xf]  ;;  %1273 = vmatpush.msra.mxu0 %v2157_v20 }
 0xc39   :  { %1024 = vst.msk [vmem:[#allocation2 + $0x1c] sm:$0xf] %vm184_vm10, %v1021_v21  ;;  %1531 = vmatmul.msk.f32.vlgmr.msrb.gmra.mxu0 %vm1047_vm2, %v1152_v45  ;;  %1537 = vmatmul.msk.f32.vlgmr.msra.gmra.mxu2 %vm1047_vm2, %v1305_v46 }
 0xc3a   :  { %1030 = vst.msk [vmem:[%s2287_s6] sm:$0xf] %vm1029_vm6, %v1021_v21  ;;  %1372 = vmatpush.msrb.mxu0 %v2138_v7  ;;  %v1356_v7 = vld [vmem:[#allocation3 + $0x18] sm:$0xf]  ;;  %s1674_s6 = smov [#allocation4]  }
 0xc3b   :  { %s1461_s25 = sshll.u32 %s1674_s6, 4  ;;  %s1462_s25 = int_to_ptr.vmem [resolvable:$true] %s1461_s25 }
 0xc3c   :  { %1373 = vmatpush.msrb.mxu0 %v2143_v12  ;;  %v1091_v12 = vpop.f32.mrf.mxu1 }
 0xc3e   :  { %v1224_v48 = vpop.f32.mrf.mxu2  ;;  %1374 = vmatpush.msrb.mxu0 %v2150_v13 }
 0xc3f   :  { %v1248_v50 = vadd.f32 %v1247_v47, %v1224_v48 }
 0xc40   :  { %v1406_v53 = vld [vmem:[#allocation2 + $0x1c] sm:$0xf]  ;;  %1375 = vmatpush.msrb.mxu0 %v2157_v20 }
 0xc41   :  { %v1250_v54 = vadd.f32 %v2209_v37, %v1248_v50  ;;  %1535 = vmatmul.msk.f32.vlgmr.msra.gmra.mxu0 %vm1047_vm2, %v1254_v51  ;;  %1541 = vmatmul.msk.f32.vlgmr.msrb.gmra.mxu2 %vm1047_vm2, %v1407_v52 }
 0xc42   :  { %1542 = vmatmul.msk.f32.vlgmr.msrb.gmra.mxu3 %vm1047_vm2, %v1406_v53 }
 0xc43   :  { %1252 = vst.msk [vmem:[#allocation4 + $0xc] sm:$0xf] %vm1098_vm11, %v1250_v54 }
 0xc44   :  { %v1196_v20 = vpop.f32.mrf.mxu1 }
 0xc49   :  { %1539 = vmatmul.msk.f32.vlgmr.msrb.gmra.mxu0 %vm1047_vm2, %v1356_v7 }
 0xc4c   :  { %v1298_v24 = vpop.f32.mrf.mxu1 }
 0xc54   :  { %v1400_v23 = vpop.f32.mrf.mxu1 }
 0xcae   :  { %v1068_v13 = vpop.f32.mrf.mxu0 }
 0xcaf   :  { %v1092_v55 = vadd.f32 %v1091_v12, %v1068_v13 }
 0xcb1   :  { %v1097_v56 = vadd.f32 %v2209_v37, %v1092_v55 }
 0xcb3   :  { %1099 = vst.msk [vmem:[#allocation4] sm:$0xf] %vm1098_vm11, %v1097_v56 }
 0xcb6   :  { %v1173_v38 = vpop.f32.mrf.mxu0 }
 0xcb7   :  { %v1197_v39 = vadd.f32 %v1196_v20, %v1173_v38 }
 0xcb9   :  { %v1199_v57 = vadd.f32 %v2209_v37, %v1197_v39 }
 0xcbb   :  { %1201 = vst.msk [vmem:[#allocation4 + $0x8] sm:$0xf] %vm1098_vm11, %v1199_v57 }
 0xcbc   :  { %v1326_v58 = vpop.f32.mrf.mxu2 }
 0xcbd   :  { %v1350_v59 = vadd.f32 %v1349_v40, %v1326_v58 }
 0xcbe   :  { %v1275_v60 = vpop.f32.mrf.mxu0 }
 0xcbf   :  { %v1352_v62 = vadd.f32 %v2209_v37, %v1350_v59  ;;  %v1299_v8 = vadd.f32 %v1298_v24, %v1275_v60 }
 0xcc1   :  { %1354 = vst.msk [vmem:[#allocation4 + $0x14] sm:$0xf] %vm1098_vm11, %v1352_v62  ;;  %v1301_v15 = vadd.f32 %v2209_v37, %v1299_v8 }
 0xcc3   :  { %1303 = vst.msk [vmem:[#allocation4 + $0x10] sm:$0xf] %vm1098_vm11, %v1301_v15 }
 0xcc4   :  { %v1428_v18 = vpop.f32.mrf.mxu2 }
 0xcc5   :  { %v1451_v19 = vpop.f32.mrf.mxu3 }
 0xcc6   :  { %v1452_v22 = vadd.f32 %v1451_v19, %v1428_v18  ;;  %v1377_v27 = vpop.f32.mrf.mxu0 }
 0xcc7   :  { %v1401_v28 = vadd.f32 %v1400_v23, %v1377_v27 }
 0xcc8   :  { %v1454_v29 = vadd.f32 %v2209_v37, %v1452_v22 }
 0xcc9   :  { %v1403_v30 = vadd.f32 %v2209_v37, %v1401_v28 }
 0xcca   :  { %1456 = vst.msk [vmem:[#allocation4 + $0x1c] sm:$0xf] %vm1098_vm11, %v1454_v29 }
 0xccb   :  { %1405 = vst.msk [vmem:[#allocation4 + $0x18] sm:$0xf] %vm1098_vm11, %v1403_v30 }
 0xccc   :  { %1469 = dma.vmem_to_hbm [thread:$0]  %s1462_s25, 512, %s1464_s28, [#allocation5], %s1672_s1, %s1672_s1, %s1675_s29  }
 0xccd   :  { %1669 = dma.done.wait [#allocation5], 512  }
 0xcce   :  { %1670 = vsyncadd [#allocation5], 4294966784 }
 0xccf   :  { %1482 = vsyncpa [#allocation5], 1 }

</bundles_post_ra>
